<compile_context>
chip_gen: v7x
topology: tpu7x:2x2x1
jax: 0.10.0
libtpu: 0.0.40
codegen_flags: <defaults>
</compile_context>

<pallas_src>
import functools

import jax
import jax.numpy as jnp
import numpy as np
from jax.experimental import pallas as pl
from jax.experimental.pallas import tpu as pltpu

# Conv geometry fixed by the PyTorch module.
K1_SIZE, S1 = 5, 5      # conv1 kernel / stride
K2_SIZE, S2 = 3, 2      # conv2 kernel / stride
NPAD = 128              # lane-dense width of the merged policy+value head output


def conv_out_hw(h, w):
    oh1 = (h - K1_SIZE) // S1 + 1
    ow1 = (w - K1_SIZE) // S1 + 1
    oh2 = (oh1 - K2_SIZE) // S2 + 1
    ow2 = (ow1 - K2_SIZE) // S2 + 1
    return oh1, ow1, oh2, ow2


# ----------------------------------------------------------------------------
# Fused Pallas kernel: conv1 -> conv2 -> merged heads, one batch tile per step
# ----------------------------------------------------------------------------
def _fused_forward_kernel(p1_ref, w1_ref, b1_ref, w2_ref, b2_ref, wh_ref, bh_ref,
                          out_ref, *, TB, OW1, OH2, OW2, KH, KW, STRIDE):
    # ---- conv1: relu(p1 @ w1 + b1); 1/256 is folded into w1, uint8->f32 cast here ----
    p1 = p1_ref[...].astype(jnp.float32)                     # [OH1*OW1*TB, C*25]
    y1 = jnp.dot(p1, w1_ref[...], preferred_element_type=jnp.float32)
    y1 = jnp.maximum(y1 + b1_ref[...], 0.0)                  # rows ordered (h1, w1, tb)

    # ---- conv2: per output position, accumulate 9 shifted [TB,64]x[64,64] matmuls.
    # Every slice is a contiguous, sublane-aligned [TB, 64] block of y1.
    y2_blocks = []
    for oh in range(OH2):
        for ow in range(OW2):
            acc = jnp.zeros((TB, b2_ref.shape[-1]), jnp.float32)
            for kh in range(KH):
                for kw in range(KW):
                    r0 = (STRIDE * oh + kh) * OW1 + (STRIDE * ow + kw)
                    blk = y1[r0 * TB:(r0 + 1) * TB, :]        # [TB, 64]
                    acc = acc + jnp.dot(blk, w2_ref[kh * KW + kw],
                                        preferred_element_type=jnp.float32)
            y2_blocks.append(jnp.maximum(acc + b2_ref[...], 0.0))

    # ---- merged policy/value head: one lane-dense [TB, 128] matmul ----
    y2 = jnp.concatenate(y2_blocks, axis=1)                   # [TB, S*64], cols (s, c)
    out_ref[...] = (jnp.dot(y2, wh_ref[...], preferred_element_type=jnp.float32)
                    + bh_ref[...])


# ----------------------------------------------------------------------------
# One-time parameter preparation (all transposes / scale folding happen here)
# ----------------------------------------------------------------------------
def prepare_params(params):
    """Fold 1/256 into w1, pre-transpose/reshape all weights, and merge the policy and
    value heads into a single lane-dense (128-wide, zero-padded) matrix whose rows are
    reordered to the kernel's (spatial, channel) column order."""
    w1, b1 = params["w1"], params["b1"]          # [64, C, 5, 5], [64]
    w2, b2 = params["w2"], params["b2"]          # [64, 64, 3, 3], [64]
    wp, bp = params["wp"], params["bp"]          # [A, F], [A]
    wv, bv = params["wv"], params["bv"]          # [1, F], [1]

    c_out1 = w1.shape[0]
    w1p = (w1.reshape(c_out1, -1).T / 256.0).astype(jnp.float32)   # [C*25, 64]
    b1p = b1.reshape(1, -1).astype(jnp.float32)

    o2, i2, kh, kw = w2.shape
    w2p = jnp.transpose(w2, (2, 3, 1, 0)).reshape(kh * kw, i2, o2).astype(jnp.float32)
    b2p = b2.reshape(1, -1).astype(jnp.float32)

    a = wp.shape[0]
    f = wp.shape[1]
    n_spatial = f // o2                           # number of conv2 output positions
    assert a + 1 <= NPAD
    w_head = jnp.concatenate([wp, wv], axis=0)    # [A+1, F]
    w_head = jnp.pad(w_head, ((0, NPAD - (a + 1)), (0, 0)))        # [128, F]
    # PyTorch flatten order of the conv output is (c, s); the kernel's y2 columns are
    # ordered (s, c), so reorder the head weights once to rows (s, c).
    whp = (w_head.T.reshape(o2, n_spatial, NPAD)
                  .transpose(1, 0, 2)
                  .reshape(n_spatial * o2, NPAD)).astype(jnp.float32)   # [S*64, 128]
    bhp = jnp.pad(jnp.concatenate([bp, bv]), (0, NPAD - (a + 1)))
    bhp = bhp.reshape(1, NPAD).astype(jnp.float32)

    return {"w1": w1p, "b1": b1p, "w2": w2p, "b2": b2p, "wh": whp, "bh": bhp}


# ----------------------------------------------------------------------------
# Forward pass (jit-able): uint8 reshape-im2col + one batch-tiled pallas_call
# ----------------------------------------------------------------------------
def model_forward(x, prepped, *, n_actions, tb=8):
    B, C, H, W = x.shape
    OH1, OW1, OH2, OW2 = conv_out_hw(H, W)
    K1 = C * K1_SIZE * K1_SIZE
    assert tb % 8 == 0, "batch tile must be a multiple of 8 (sublane alignment)"

    # Pad batch to a multiple of the batch tile.
    NT = pl.cdiv(B, tb)
    Bp = NT * tb
    if Bp != B:
        x = jnp.pad(x, ((0, Bp - B), (0, 0), (0, 0), (0, 0)))

    # conv1 im2col is a pure reshape+transpose (stride == kernel -> non-overlapping 5x5
    # blocks), done on the raw (uint8) pixels.  Rows are ordered (tile, h1, w1, b-in-tile)
    # so the batch grid tiles rows contiguously and every conv2 slice in the kernel is a
    # whole [tb, 64] block.
    xc = x[:, :, :OH1 * S1, :OW1 * S1]
    p1 = (xc.reshape(NT, tb, C, OH1, K1_SIZE, OW1, K1_SIZE)
            .transpose(0, 3, 5, 1, 2, 4, 6)
            .reshape(NT * OH1 * OW1 * tb, K1))
    if p1.dtype.itemsize == 1:
        assert (tb * OH1 * OW1) % 32 == 0, "8-bit p1 tile needs 32-row alignment"

    m_tile = OH1 * OW1 * tb
    kernel = functools.partial(
        _fused_forward_kernel,
        TB=tb, OW1=OW1, OH2=OH2, OW2=OW2, KH=K2_SIZE, KW=K2_SIZE, STRIDE=S2)

    out = pl.pallas_call(
        kernel,
        out_shape=jax.ShapeDtypeStruct((Bp, NPAD), jnp.float32),
        grid=(NT,),
        in_specs=[
            pl.BlockSpec((m_tile, K1), lambda i: (i, 0)),             # p1: batch-tiled
            pl.BlockSpec(prepped["w1"].shape, lambda i: (0, 0)),      # weights resident
            pl.BlockSpec(prepped["b1"].shape, lambda i: (0, 0)),
            pl.BlockSpec(prepped["w2"].shape, lambda i: (0, 0, 0)),
            pl.BlockSpec(prepped["b2"].shape, lambda i: (0, 0)),
            pl.BlockSpec(prepped["wh"].shape, lambda i: (0, 0)),
            pl.BlockSpec(prepped["bh"].shape, lambda i: (0, 0)),
        ],
        out_specs=pl.BlockSpec((tb, NPAD), lambda i: (i, 0)),
        compiler_params=pltpu.CompilerParams(
            dimension_semantics=("parallel",)),
    )(p1, prepped["w1"], prepped["b1"], prepped["w2"], prepped["b2"],
      prepped["wh"], prepped["bh"])

    pol = out[:B, :n_actions]
    val = out[:B, n_actions:n_actions + 1]
    return pol, val


# ----------------------------------------------------------------------------
# Pure-JAX reference (for correctness check) — uses the ORIGINAL params
# ----------------------------------------------------------------------------
def ref_forward(x, params):
    fx = x.astype(jnp.float32) / 256.0
    dn = ("NCHW", "OIHW", "NCHW")
    y = jax.lax.conv_general_dilated(fx, params["w1"], (S1, S1), "VALID",
                                     dimension_numbers=dn)
    y = jnp.maximum(y + params["b1"][None, :, None, None], 0.0)
    y = jax.lax.conv_general_dilated(y, params["w2"], (S2, S2), "VALID",
                                     dimension_numbers=dn)
    y = jnp.maximum(y + params["b2"][None, :, None, None], 0.0)
    flat = y.reshape(x.shape[0], -1)
    pol = flat @ params["wp"].T + params["bp"]
    val = flat @ params["wv"].T + params["bv"]
    return pol, val


# ----------------------------------------------------------------------------
# Deterministic parameter init (PyTorch-like uniform(-1/sqrt(fan_in), +))
# ----------------------------------------------------------------------------
def init_params(key, c_in, n_actions, conv_out_size):
    ks = jax.random.split(key, 8)

    def u(k, shape, fan_in):
        bound = 1.0 / np.sqrt(fan_in)
        return jax.random.uniform(k, shape, jnp.float32, -bound, bound)

    return {
        "w1": u(ks[0], (64, c_in, 5, 5), c_in * 25),
        "b1": u(ks[1], (64,), c_in * 25),
        "w2": u(ks[2], (64, 64, 3, 3), 64 * 9),
        "b2": u(ks[3], (64,), 64 * 9),
        "wp": u(ks[4], (n_actions, conv_out_size), conv_out_size),
        "bp": u(ks[5], (n_actions,), conv_out_size),
        "wv": u(ks[6], (1, conv_out_size), conv_out_size),
        "bv": u(ks[7], (1,), conv_out_size),
    }


if __name__ == "__main__":
    # Small shapes: B=16, C=4, H=W=30, n_actions=6
    #   conv1 (k5,s5): 30 -> 6 ; conv2 (k3,s2): 6 -> 2 ; conv_out = 64*2*2 = 256
    B, C, H, W = 16, 4, 30, 30
    n_actions = 6
    _, _, oh2, ow2 = conv_out_hw(H, W)
    conv_out_size = 64 * oh2 * ow2

    key = jax.random.PRNGKey(0)
    k_x, k_p = jax.random.split(key)
    # uint8 pixel frames (matches x.float()/256 usage in the module)
    x = jax.random.randint(k_x, (B, C, H, W), 0, 256, dtype=jnp.int32).astype(jnp.uint8)
    params = init_params(k_p, C, n_actions, conv_out_size)

    prepped = prepare_params(params)                      # one-time weight prep
    fwd = jax.jit(functools.partial(model_forward, n_actions=n_actions, tb=8))

    pol, val = jax.block_until_ready(fwd(x, prepped))
    pol_ref, val_ref = ref_forward(x, params)

    np.testing.assert_allclose(np.asarray(pol), np.asarray(pol_ref), rtol=1e-4, atol=2e-4)
    np.testing.assert_allclose(np.asarray(val), np.asarray(val_ref), rtol=1e-4, atol=2e-4)
    assert pol.shape == (B, n_actions) and val.shape == (B, 1)

    print("KERNEL_OK")
</pallas_src>

<mosaic_0001>
module attributes {stable_mosaic.version = 11 : i64} {
  func.func @_fused_forward_kernel(%arg0: i32, %arg1: memref<288x100xi8, #tpu.memory_space<vmem>>, %arg2: memref<100x64xf32, #tpu.memory_space<vmem>>, %arg3: memref<1x64xf32, #tpu.memory_space<vmem>>, %arg4: memref<9x64x64xf32, #tpu.memory_space<vmem>>, %arg5: memref<1x64xf32, #tpu.memory_space<vmem>>, %arg6: memref<256x128xf32, #tpu.memory_space<vmem>>, %arg7: memref<1x128xf32, #tpu.memory_space<vmem>>, %arg8: memref<8x128xf32, #tpu.memory_space<vmem>>) attributes {dimension_semantics = [#tpu.dimension_semantics<parallel>], iteration_bounds = array<i64: 2>, scalar_prefetch = 0 : i64, scratch_operands = 0 : i64, tpu.core_type = #tpu.core_type<tc>, window_params = [{transform_indices = @transform_0, window_bounds = array<i64: 288, 100>}, {pipeline_mode = #tpu.pipeline_mode<synchronous>, transform_indices = @transform_1, window_bounds = array<i64: 100, 64>}, {pipeline_mode = #tpu.pipeline_mode<synchronous>, transform_indices = @transform_2, window_bounds = array<i64: 1, 64>}, {pipeline_mode = #tpu.pipeline_mode<synchronous>, transform_indices = @transform_3, window_bounds = array<i64: 9, 64, 64>}, {pipeline_mode = #tpu.pipeline_mode<synchronous>, transform_indices = @transform_4, window_bounds = array<i64: 1, 64>}, {pipeline_mode = #tpu.pipeline_mode<synchronous>, transform_indices = @transform_5, window_bounds = array<i64: 256, 128>}, {pipeline_mode = #tpu.pipeline_mode<synchronous>, transform_indices = @transform_6, window_bounds = array<i64: 1, 128>}, {transform_indices = @transform_7, window_bounds = array<i64: 8, 128>}]} {
    %c0 = arith.constant 0 : index
    %c0_0 = arith.constant 0 : index
    %0 = vector.load %arg1[%c0, %c0_0] : memref<288x100xi8, #tpu.memory_space<vmem>>, vector<288x100xi8>
    %1 = arith.uitofp %0 : vector<288x100xi8> to vector<288x100xf32>
    %c0_1 = arith.constant 0 : index
    %c0_2 = arith.constant 0 : index
    %2 = vector.load %arg2[%c0_1, %c0_2] : memref<100x64xf32, #tpu.memory_space<vmem>>, vector<100x64xf32>
    %cst = arith.constant dense<0.000000e+00> : vector<288x64xf32>
    %3 = tpu.matmul %1, %2, %cst {dimension_numbers = #tpu.dot_dimension_numbers<[1], [0], [0], [1], [0, 0, 1, 1], [], []>} : vector<288x100xf32>, vector<100x64xf32>, vector<288x64xf32> -> vector<288x64xf32>
    %c0_3 = arith.constant 0 : index
    %c0_4 = arith.constant 0 : index
    %4 = vector.load %arg3[%c0_3, %c0_4] : memref<1x64xf32, #tpu.memory_space<vmem>>, vector<1x64xf32>
    %5 = vector.broadcast %4 : vector<1x64xf32> to vector<288x64xf32>
    %6 = arith.addf %3, %5 : vector<288x64xf32>
    %cst_5 = arith.constant 0.000000e+00 : f32
    %7 = vector.broadcast %cst_5 : f32 to vector<288x64xf32>
    %8 = arith.maximumf %6, %7 : vector<288x64xf32>
    %cst_6 = arith.constant 0.000000e+00 : f32
    %9 = vector.broadcast %cst_6 : f32 to vector<8x64xf32>
    %10 = vector.extract_strided_slice %8 {offsets = [0, 0], sizes = [8, 64], strides = [1, 1]} : vector<288x64xf32> to vector<8x64xf32>
    %c0_7 = arith.constant 0 : index
    %c0_8 = arith.constant 0 : index
    %c0_9 = arith.constant 0 : index
    %11 = vector.load %arg4[%c0_7, %c0_8, %c0_9] : memref<9x64x64xf32, #tpu.memory_space<vmem>>, vector<1x64x64xf32>
    %12 = vector.shape_cast %11 : vector<1x64x64xf32> to vector<64x64xf32>
    %cst_10 = arith.constant dense<0.000000e+00> : vector<8x64xf32>
    %13 = tpu.matmul %10, %12, %cst_10 {dimension_numbers = #tpu.dot_dimension_numbers<[1], [0], [0], [1], [0, 0, 1, 1], [], []>} : vector<8x64xf32>, vector<64x64xf32>, vector<8x64xf32> -> vector<8x64xf32>
    %14 = arith.addf %9, %13 : vector<8x64xf32>
    %15 = vector.extract_strided_slice %8 {offsets = [8, 0], sizes = [8, 64], strides = [1, 1]} : vector<288x64xf32> to vector<8x64xf32>
    %c1 = arith.constant 1 : index
    %c0_11 = arith.constant 0 : index
    %c0_12 = arith.constant 0 : index
    %16 = vector.load %arg4[%c1, %c0_11, %c0_12] : memref<9x64x64xf32, #tpu.memory_space<vmem>>, vector<1x64x64xf32>
    %17 = vector.shape_cast %16 : vector<1x64x64xf32> to vector<64x64xf32>
    %cst_13 = arith.constant dense<0.000000e+00> : vector<8x64xf32>
    %18 = tpu.matmul %15, %17, %cst_13 {dimension_numbers = #tpu.dot_dimension_numbers<[1], [0], [0], [1], [0, 0, 1, 1], [], []>} : vector<8x64xf32>, vector<64x64xf32>, vector<8x64xf32> -> vector<8x64xf32>
    %19 = arith.addf %14, %18 : vector<8x64xf32>
    %20 = vector.extract_strided_slice %8 {offsets = [16, 0], sizes = [8, 64], strides = [1, 1]} : vector<288x64xf32> to vector<8x64xf32>
    %c2 = arith.constant 2 : index
    %c0_14 = arith.constant 0 : index
    %c0_15 = arith.constant 0 : index
    %21 = vector.load %arg4[%c2, %c0_14, %c0_15] : memref<9x64x64xf32, #tpu.memory_space<vmem>>, vector<1x64x64xf32>
    %22 = vector.shape_cast %21 : vector<1x64x64xf32> to vector<64x64xf32>
    %cst_16 = arith.constant dense<0.000000e+00> : vector<8x64xf32>
    %23 = tpu.matmul %20, %22, %cst_16 {dimension_numbers = #tpu.dot_dimension_numbers<[1], [0], [0], [1], [0, 0, 1, 1], [], []>} : vector<8x64xf32>, vector<64x64xf32>, vector<8x64xf32> -> vector<8x64xf32>
    %24 = arith.addf %19, %23 : vector<8x64xf32>
    %25 = vector.extract_strided_slice %8 {offsets = [48, 0], sizes = [8, 64], strides = [1, 1]} : vector<288x64xf32> to vector<8x64xf32>
    %c3 = arith.constant 3 : index
    %c0_17 = arith.constant 0 : index
    %c0_18 = arith.constant 0 : index
    %26 = vector.load %arg4[%c3, %c0_17, %c0_18] : memref<9x64x64xf32, #tpu.memory_space<vmem>>, vector<1x64x64xf32>
    %27 = vector.shape_cast %26 : vector<1x64x64xf32> to vector<64x64xf32>
    %cst_19 = arith.constant dense<0.000000e+00> : vector<8x64xf32>
    %28 = tpu.matmul %25, %27, %cst_19 {dimension_numbers = #tpu.dot_dimension_numbers<[1], [0], [0], [1], [0, 0, 1, 1], [], []>} : vector<8x64xf32>, vector<64x64xf32>, vector<8x64xf32> -> vector<8x64xf32>
    %29 = arith.addf %24, %28 : vector<8x64xf32>
    %30 = vector.extract_strided_slice %8 {offsets = [56, 0], sizes = [8, 64], strides = [1, 1]} : vector<288x64xf32> to vector<8x64xf32>
    %c4 = arith.constant 4 : index
    %c0_20 = arith.constant 0 : index
    %c0_21 = arith.constant 0 : index
    %31 = vector.load %arg4[%c4, %c0_20, %c0_21] : memref<9x64x64xf32, #tpu.memory_space<vmem>>, vector<1x64x64xf32>
    %32 = vector.shape_cast %31 : vector<1x64x64xf32> to vector<64x64xf32>
    %cst_22 = arith.constant dense<0.000000e+00> : vector<8x64xf32>
    %33 = tpu.matmul %30, %32, %cst_22 {dimension_numbers = #tpu.dot_dimension_numbers<[1], [0], [0], [1], [0, 0, 1, 1], [], []>} : vector<8x64xf32>, vector<64x64xf32>, vector<8x64xf32> -> vector<8x64xf32>
    %34 = arith.addf %29, %33 : vector<8x64xf32>
    %35 = vector.extract_strided_slice %8 {offsets = [64, 0], sizes = [8, 64], strides = [1, 1]} : vector<288x64xf32> to vector<8x64xf32>
    %c5 = arith.constant 5 : index
    %c0_23 = arith.constant 0 : index
    %c0_24 = arith.constant 0 : index
    %36 = vector.load %arg4[%c5, %c0_23, %c0_24] : memref<9x64x64xf32, #tpu.memory_space<vmem>>, vector<1x64x64xf32>
    %37 = vector.shape_cast %36 : vector<1x64x64xf32> to vector<64x64xf32>
    %cst_25 = arith.constant dense<0.000000e+00> : vector<8x64xf32>
    %38 = tpu.matmul %35, %37, %cst_25 {dimension_numbers = #tpu.dot_dimension_numbers<[1], [0], [0], [1], [0, 0, 1, 1], [], []>} : vector<8x64xf32>, vector<64x64xf32>, vector<8x64xf32> -> vector<8x64xf32>
    %39 = arith.addf %34, %38 : vector<8x64xf32>
    %40 = vector.extract_strided_slice %8 {offsets = [96, 0], sizes = [8, 64], strides = [1, 1]} : vector<288x64xf32> to vector<8x64xf32>
    %c6 = arith.constant 6 : index
    %c0_26 = arith.constant 0 : index
    %c0_27 = arith.constant 0 : index
    %41 = vector.load %arg4[%c6, %c0_26, %c0_27] : memref<9x64x64xf32, #tpu.memory_space<vmem>>, vector<1x64x64xf32>
    %42 = vector.shape_cast %41 : vector<1x64x64xf32> to vector<64x64xf32>
    %cst_28 = arith.constant dense<0.000000e+00> : vector<8x64xf32>
    %43 = tpu.matmul %40, %42, %cst_28 {dimension_numbers = #tpu.dot_dimension_numbers<[1], [0], [0], [1], [0, 0, 1, 1], [], []>} : vector<8x64xf32>, vector<64x64xf32>, vector<8x64xf32> -> vector<8x64xf32>
    %44 = arith.addf %39, %43 : vector<8x64xf32>
    %45 = vector.extract_strided_slice %8 {offsets = [104, 0], sizes = [8, 64], strides = [1, 1]} : vector<288x64xf32> to vector<8x64xf32>
    %c7 = arith.constant 7 : index
    %c0_29 = arith.constant 0 : index
    %c0_30 = arith.constant 0 : index
    %46 = vector.load %arg4[%c7, %c0_29, %c0_30] : memref<9x64x64xf32, #tpu.memory_space<vmem>>, vector<1x64x64xf32>
    %47 = vector.shape_cast %46 : vector<1x64x64xf32> to vector<64x64xf32>
    %cst_31 = arith.constant dense<0.000000e+00> : vector<8x64xf32>
    %48 = tpu.matmul %45, %47, %cst_31 {dimension_numbers = #tpu.dot_dimension_numbers<[1], [0], [0], [1], [0, 0, 1, 1], [], []>} : vector<8x64xf32>, vector<64x64xf32>, vector<8x64xf32> -> vector<8x64xf32>
    %49 = arith.addf %44, %48 : vector<8x64xf32>
    %50 = vector.extract_strided_slice %8 {offsets = [112, 0], sizes = [8, 64], strides = [1, 1]} : vector<288x64xf32> to vector<8x64xf32>
    %c8 = arith.constant 8 : index
    %c0_32 = arith.constant 0 : index
    %c0_33 = arith.constant 0 : index
    %51 = vector.load %arg4[%c8, %c0_32, %c0_33] : memref<9x64x64xf32, #tpu.memory_space<vmem>>, vector<1x64x64xf32>
    %52 = vector.shape_cast %51 : vector<1x64x64xf32> to vector<64x64xf32>
    %cst_34 = arith.constant dense<0.000000e+00> : vector<8x64xf32>
    %53 = tpu.matmul %50, %52, %cst_34 {dimension_numbers = #tpu.dot_dimension_numbers<[1], [0], [0], [1], [0, 0, 1, 1], [], []>} : vector<8x64xf32>, vector<64x64xf32>, vector<8x64xf32> -> vector<8x64xf32>
    %54 = arith.addf %49, %53 : vector<8x64xf32>
    %c0_35 = arith.constant 0 : index
    %c0_36 = arith.constant 0 : index
    %55 = vector.load %arg5[%c0_35, %c0_36] : memref<1x64xf32, #tpu.memory_space<vmem>>, vector<1x64xf32>
    %56 = vector.broadcast %55 : vector<1x64xf32> to vector<8x64xf32>
    %57 = arith.addf %54, %56 : vector<8x64xf32>
    %cst_37 = arith.constant 0.000000e+00 : f32
    %58 = vector.broadcast %cst_37 : f32 to vector<8x64xf32>
    %59 = arith.maximumf %57, %58 : vector<8x64xf32>
    %cst_38 = arith.constant 0.000000e+00 : f32
    %60 = vector.broadcast %cst_38 : f32 to vector<8x64xf32>
    %61 = vector.extract_strided_slice %8 {offsets = [16, 0], sizes = [8, 64], strides = [1, 1]} : vector<288x64xf32> to vector<8x64xf32>
    %c0_39 = arith.constant 0 : index
    %c0_40 = arith.constant 0 : index
    %c0_41 = arith.constant 0 : index
    %62 = vector.load %arg4[%c0_39, %c0_40, %c0_41] : memref<9x64x64xf32, #tpu.memory_space<vmem>>, vector<1x64x64xf32>
    %63 = vector.shape_cast %62 : vector<1x64x64xf32> to vector<64x64xf32>
    %cst_42 = arith.constant dense<0.000000e+00> : vector<8x64xf32>
    %64 = tpu.matmul %61, %63, %cst_42 {dimension_numbers = #tpu.dot_dimension_numbers<[1], [0], [0], [1], [0, 0, 1, 1], [], []>} : vector<8x64xf32>, vector<64x64xf32>, vector<8x64xf32> -> vector<8x64xf32>
    %65 = arith.addf %60, %64 : vector<8x64xf32>
    %66 = vector.extract_strided_slice %8 {offsets = [24, 0], sizes = [8, 64], strides = [1, 1]} : vector<288x64xf32> to vector<8x64xf32>
    %c1_43 = arith.constant 1 : index
    %c0_44 = arith.constant 0 : index
    %c0_45 = arith.constant 0 : index
    %67 = vector.load %arg4[%c1_43, %c0_44, %c0_45] : memref<9x64x64xf32, #tpu.memory_space<vmem>>, vector<1x64x64xf32>
    %68 = vector.shape_cast %67 : vector<1x64x64xf32> to vector<64x64xf32>
    %cst_46 = arith.constant dense<0.000000e+00> : vector<8x64xf32>
    %69 = tpu.matmul %66, %68, %cst_46 {dimension_numbers = #tpu.dot_dimension_numbers<[1], [0], [0], [1], [0, 0, 1, 1], [], []>} : vector<8x64xf32>, vector<64x64xf32>, vector<8x64xf32> -> vector<8x64xf32>
    %70 = arith.addf %65, %69 : vector<8x64xf32>
    %71 = vector.extract_strided_slice %8 {offsets = [32, 0], sizes = [8, 64], strides = [1, 1]} : vector<288x64xf32> to vector<8x64xf32>
    %c2_47 = arith.constant 2 : index
    %c0_48 = arith.constant 0 : index
    %c0_49 = arith.constant 0 : index
    %72 = vector.load %arg4[%c2_47, %c0_48, %c0_49] : memref<9x64x64xf32, #tpu.memory_space<vmem>>, vector<1x64x64xf32>
    %73 = vector.shape_cast %72 : vector<1x64x64xf32> to vector<64x64xf32>
    %cst_50 = arith.constant dense<0.000000e+00> : vector<8x64xf32>
    %74 = tpu.matmul %71, %73, %cst_50 {dimension_numbers = #tpu.dot_dimension_numbers<[1], [0], [0], [1], [0, 0, 1, 1], [], []>} : vector<8x64xf32>, vector<64x64xf32>, vector<8x64xf32> -> vector<8x64xf32>
    %75 = arith.addf %70, %74 : vector<8x64xf32>
    %76 = vector.extract_strided_slice %8 {offsets = [64, 0], sizes = [8, 64], strides = [1, 1]} : vector<288x64xf32> to vector<8x64xf32>
    %c3_51 = arith.constant 3 : index
    %c0_52 = arith.constant 0 : index
    %c0_53 = arith.constant 0 : index
    %77 = vector.load %arg4[%c3_51, %c0_52, %c0_53] : memref<9x64x64xf32, #tpu.memory_space<vmem>>, vector<1x64x64xf32>
    %78 = vector.shape_cast %77 : vector<1x64x64xf32> to vector<64x64xf32>
    %cst_54 = arith.constant dense<0.000000e+00> : vector<8x64xf32>
    %79 = tpu.matmul %76, %78, %cst_54 {dimension_numbers = #tpu.dot_dimension_numbers<[1], [0], [0], [1], [0, 0, 1, 1], [], []>} : vector<8x64xf32>, vector<64x64xf32>, vector<8x64xf32> -> vector<8x64xf32>
    %80 = arith.addf %75, %79 : vector<8x64xf32>
    %81 = vector.extract_strided_slice %8 {offsets = [72, 0], sizes = [8, 64], strides = [1, 1]} : vector<288x64xf32> to vector<8x64xf32>
    %c4_55 = arith.constant 4 : index
    %c0_56 = arith.constant 0 : index
    %c0_57 = arith.constant 0 : index
    %82 = vector.load %arg4[%c4_55, %c0_56, %c0_57] : memref<9x64x64xf32, #tpu.memory_space<vmem>>, vector<1x64x64xf32>
    %83 = vector.shape_cast %82 : vector<1x64x64xf32> to vector<64x64xf32>
    %cst_58 = arith.constant dense<0.000000e+00> : vector<8x64xf32>
    %84 = tpu.matmul %81, %83, %cst_58 {dimension_numbers = #tpu.dot_dimension_numbers<[1], [0], [0], [1], [0, 0, 1, 1], [], []>} : vector<8x64xf32>, vector<64x64xf32>, vector<8x64xf32> -> vector<8x64xf32>
    %85 = arith.addf %80, %84 : vector<8x64xf32>
    %86 = vector.extract_strided_slice %8 {offsets = [80, 0], sizes = [8, 64], strides = [1, 1]} : vector<288x64xf32> to vector<8x64xf32>
    %c5_59 = arith.constant 5 : index
    %c0_60 = arith.constant 0 : index
    %c0_61 = arith.constant 0 : index
    %87 = vector.load %arg4[%c5_59, %c0_60, %c0_61] : memref<9x64x64xf32, #tpu.memory_space<vmem>>, vector<1x64x64xf32>
    %88 = vector.shape_cast %87 : vector<1x64x64xf32> to vector<64x64xf32>
    %cst_62 = arith.constant dense<0.000000e+00> : vector<8x64xf32>
    %89 = tpu.matmul %86, %88, %cst_62 {dimension_numbers = #tpu.dot_dimension_numbers<[1], [0], [0], [1], [0, 0, 1, 1], [], []>} : vector<8x64xf32>, vector<64x64xf32>, vector<8x64xf32> -> vector<8x64xf32>
    %90 = arith.addf %85, %89 : vector<8x64xf32>
    %91 = vector.extract_strided_slice %8 {offsets = [112, 0], sizes = [8, 64], strides = [1, 1]} : vector<288x64xf32> to vector<8x64xf32>
    %c6_63 = arith.constant 6 : index
    %c0_64 = arith.constant 0 : index
    %c0_65 = arith.constant 0 : index
    %92 = vector.load %arg4[%c6_63, %c0_64, %c0_65] : memref<9x64x64xf32, #tpu.memory_space<vmem>>, vector<1x64x64xf32>
    %93 = vector.shape_cast %92 : vector<1x64x64xf32> to vector<64x64xf32>
    %cst_66 = arith.constant dense<0.000000e+00> : vector<8x64xf32>
    %94 = tpu.matmul %91, %93, %cst_66 {dimension_numbers = #tpu.dot_dimension_numbers<[1], [0], [0], [1], [0, 0, 1, 1], [], []>} : vector<8x64xf32>, vector<64x64xf32>, vector<8x64xf32> -> vector<8x64xf32>
    %95 = arith.addf %90, %94 : vector<8x64xf32>
    %96 = vector.extract_strided_slice %8 {offsets = [120, 0], sizes = [8, 64], strides = [1, 1]} : vector<288x64xf32> to vector<8x64xf32>
    %c7_67 = arith.constant 7 : index
    %c0_68 = arith.constant 0 : index
    %c0_69 = arith.constant 0 : index
    %97 = vector.load %arg4[%c7_67, %c0_68, %c0_69] : memref<9x64x64xf32, #tpu.memory_space<vmem>>, vector<1x64x64xf32>
    %98 = vector.shape_cast %97 : vector<1x64x64xf32> to vector<64x64xf32>
    %cst_70 = arith.constant dense<0.000000e+00> : vector<8x64xf32>
    %99 = tpu.matmul %96, %98, %cst_70 {dimension_numbers = #tpu.dot_dimension_numbers<[1], [0], [0], [1], [0, 0, 1, 1], [], []>} : vector<8x64xf32>, vector<64x64xf32>, vector<8x64xf32> -> vector<8x64xf32>
    %100 = arith.addf %95, %99 : vector<8x64xf32>
    %101 = vector.extract_strided_slice %8 {offsets = [128, 0], sizes = [8, 64], strides = [1, 1]} : vector<288x64xf32> to vector<8x64xf32>
    %c8_71 = arith.constant 8 : index
    %c0_72 = arith.constant 0 : index
    %c0_73 = arith.constant 0 : index
    %102 = vector.load %arg4[%c8_71, %c0_72, %c0_73] : memref<9x64x64xf32, #tpu.memory_space<vmem>>, vector<1x64x64xf32>
    %103 = vector.shape_cast %102 : vector<1x64x64xf32> to vector<64x64xf32>
    %cst_74 = arith.constant dense<0.000000e+00> : vector<8x64xf32>
    %104 = tpu.matmul %101, %103, %cst_74 {dimension_numbers = #tpu.dot_dimension_numbers<[1], [0], [0], [1], [0, 0, 1, 1], [], []>} : vector<8x64xf32>, vector<64x64xf32>, vector<8x64xf32> -> vector<8x64xf32>
    %105 = arith.addf %100, %104 : vector<8x64xf32>
    %c0_75 = arith.constant 0 : index
    %c0_76 = arith.constant 0 : index
    %106 = vector.load %arg5[%c0_75, %c0_76] : memref<1x64xf32, #tpu.memory_space<vmem>>, vector<1x64xf32>
    %107 = vector.broadcast %106 : vector<1x64xf32> to vector<8x64xf32>
    %108 = arith.addf %105, %107 : vector<8x64xf32>
    %cst_77 = arith.constant 0.000000e+00 : f32
    %109 = vector.broadcast %cst_77 : f32 to vector<8x64xf32>
    %110 = arith.maximumf %108, %109 : vector<8x64xf32>
    %cst_78 = arith.constant 0.000000e+00 : f32
    %111 = vector.broadcast %cst_78 : f32 to vector<8x64xf32>
    %112 = vector.extract_strided_slice %8 {offsets = [96, 0], sizes = [8, 64], strides = [1, 1]} : vector<288x64xf32> to vector<8x64xf32>
    %c0_79 = arith.constant 0 : index
    %c0_80 = arith.constant 0 : index
    %c0_81 = arith.constant 0 : index
    %113 = vector.load %arg4[%c0_79, %c0_80, %c0_81] : memref<9x64x64xf32, #tpu.memory_space<vmem>>, vector<1x64x64xf32>
    %114 = vector.shape_cast %113 : vector<1x64x64xf32> to vector<64x64xf32>
    %cst_82 = arith.constant dense<0.000000e+00> : vector<8x64xf32>
    %115 = tpu.matmul %112, %114, %cst_82 {dimension_numbers = #tpu.dot_dimension_numbers<[1], [0], [0], [1], [0, 0, 1, 1], [], []>} : vector<8x64xf32>, vector<64x64xf32>, vector<8x64xf32> -> vector<8x64xf32>
    %116 = arith.addf %111, %115 : vector<8x64xf32>
    %117 = vector.extract_strided_slice %8 {offsets = [104, 0], sizes = [8, 64], strides = [1, 1]} : vector<288x64xf32> to vector<8x64xf32>
    %c1_83 = arith.constant 1 : index
    %c0_84 = arith.constant 0 : index
    %c0_85 = arith.constant 0 : index
    %118 = vector.load %arg4[%c1_83, %c0_84, %c0_85] : memref<9x64x64xf32, #tpu.memory_space<vmem>>, vector<1x64x64xf32>
    %119 = vector.shape_cast %118 : vector<1x64x64xf32> to vector<64x64xf32>
    %cst_86 = arith.constant dense<0.000000e+00> : vector<8x64xf32>
    %120 = tpu.matmul %117, %119, %cst_86 {dimension_numbers = #tpu.dot_dimension_numbers<[1], [0], [0], [1], [0, 0, 1, 1], [], []>} : vector<8x64xf32>, vector<64x64xf32>, vector<8x64xf32> -> vector<8x64xf32>
    %121 = arith.addf %116, %120 : vector<8x64xf32>
    %122 = vector.extract_strided_slice %8 {offsets = [112, 0], sizes = [8, 64], strides = [1, 1]} : vector<288x64xf32> to vector<8x64xf32>
    %c2_87 = arith.constant 2 : index
    %c0_88 = arith.constant 0 : index
    %c0_89 = arith.constant 0 : index
    %123 = vector.load %arg4[%c2_87, %c0_88, %c0_89] : memref<9x64x64xf32, #tpu.memory_space<vmem>>, vector<1x64x64xf32>
    %124 = vector.shape_cast %123 : vector<1x64x64xf32> to vector<64x64xf32>
    %cst_90 = arith.constant dense<0.000000e+00> : vector<8x64xf32>
    %125 = tpu.matmul %122, %124, %cst_90 {dimension_numbers = #tpu.dot_dimension_numbers<[1], [0], [0], [1], [0, 0, 1, 1], [], []>} : vector<8x64xf32>, vector<64x64xf32>, vector<8x64xf32> -> vector<8x64xf32>
    %126 = arith.addf %121, %125 : vector<8x64xf32>
    %127 = vector.extract_strided_slice %8 {offsets = [144, 0], sizes = [8, 64], strides = [1, 1]} : vector<288x64xf32> to vector<8x64xf32>
    %c3_91 = arith.constant 3 : index
    %c0_92 = arith.constant 0 : index
    %c0_93 = arith.constant 0 : index
    %128 = vector.load %arg4[%c3_91, %c0_92, %c0_93] : memref<9x64x64xf32, #tpu.memory_space<vmem>>, vector<1x64x64xf32>
    %129 = vector.shape_cast %128 : vector<1x64x64xf32> to vector<64x64xf32>
    %cst_94 = arith.constant dense<0.000000e+00> : vector<8x64xf32>
    %130 = tpu.matmul %127, %129, %cst_94 {dimension_numbers = #tpu.dot_dimension_numbers<[1], [0], [0], [1], [0, 0, 1, 1], [], []>} : vector<8x64xf32>, vector<64x64xf32>, vector<8x64xf32> -> vector<8x64xf32>
    %131 = arith.addf %126, %130 : vector<8x64xf32>
    %132 = vector.extract_strided_slice %8 {offsets = [152, 0], sizes = [8, 64], strides = [1, 1]} : vector<288x64xf32> to vector<8x64xf32>
    %c4_95 = arith.constant 4 : index
    %c0_96 = arith.constant 0 : index
    %c0_97 = arith.constant 0 : index
    %133 = vector.load %arg4[%c4_95, %c0_96, %c0_97] : memref<9x64x64xf32, #tpu.memory_space<vmem>>, vector<1x64x64xf32>
    %134 = vector.shape_cast %133 : vector<1x64x64xf32> to vector<64x64xf32>
    %cst_98 = arith.constant dense<0.000000e+00> : vector<8x64xf32>
    %135 = tpu.matmul %132, %134, %cst_98 {dimension_numbers = #tpu.dot_dimension_numbers<[1], [0], [0], [1], [0, 0, 1, 1], [], []>} : vector<8x64xf32>, vector<64x64xf32>, vector<8x64xf32> -> vector<8x64xf32>
    %136 = arith.addf %131, %135 : vector<8x64xf32>
    %137 = vector.extract_strided_slice %8 {offsets = [160, 0], sizes = [8, 64], strides = [1, 1]} : vector<288x64xf32> to vector<8x64xf32>
    %c5_99 = arith.constant 5 : index
    %c0_100 = arith.constant 0 : index
    %c0_101 = arith.constant 0 : index
    %138 = vector.load %arg4[%c5_99, %c0_100, %c0_101] : memref<9x64x64xf32, #tpu.memory_space<vmem>>, vector<1x64x64xf32>
    %139 = vector.shape_cast %138 : vector<1x64x64xf32> to vector<64x64xf32>
    %cst_102 = arith.constant dense<0.000000e+00> : vector<8x64xf32>
    %140 = tpu.matmul %137, %139, %cst_102 {dimension_numbers = #tpu.dot_dimension_numbers<[1], [0], [0], [1], [0, 0, 1, 1], [], []>} : vector<8x64xf32>, vector<64x64xf32>, vector<8x64xf32> -> vector<8x64xf32>
    %141 = arith.addf %136, %140 : vector<8x64xf32>
    %142 = vector.extract_strided_slice %8 {offsets = [192, 0], sizes = [8, 64], strides = [1, 1]} : vector<288x64xf32> to vector<8x64xf32>
    %c6_103 = arith.constant 6 : index
    %c0_104 = arith.constant 0 : index
    %c0_105 = arith.constant 0 : index
    %143 = vector.load %arg4[%c6_103, %c0_104, %c0_105] : memref<9x64x64xf32, #tpu.memory_space<vmem>>, vector<1x64x64xf32>
    %144 = vector.shape_cast %143 : vector<1x64x64xf32> to vector<64x64xf32>
    %cst_106 = arith.constant dense<0.000000e+00> : vector<8x64xf32>
    %145 = tpu.matmul %142, %144, %cst_106 {dimension_numbers = #tpu.dot_dimension_numbers<[1], [0], [0], [1], [0, 0, 1, 1], [], []>} : vector<8x64xf32>, vector<64x64xf32>, vector<8x64xf32> -> vector<8x64xf32>
    %146 = arith.addf %141, %145 : vector<8x64xf32>
    %147 = vector.extract_strided_slice %8 {offsets = [200, 0], sizes = [8, 64], strides = [1, 1]} : vector<288x64xf32> to vector<8x64xf32>
    %c7_107 = arith.constant 7 : index
    %c0_108 = arith.constant 0 : index
    %c0_109 = arith.constant 0 : index
    %148 = vector.load %arg4[%c7_107, %c0_108, %c0_109] : memref<9x64x64xf32, #tpu.memory_space<vmem>>, vector<1x64x64xf32>
    %149 = vector.shape_cast %148 : vector<1x64x64xf32> to vector<64x64xf32>
    %cst_110 = arith.constant dense<0.000000e+00> : vector<8x64xf32>
    %150 = tpu.matmul %147, %149, %cst_110 {dimension_numbers = #tpu.dot_dimension_numbers<[1], [0], [0], [1], [0, 0, 1, 1], [], []>} : vector<8x64xf32>, vector<64x64xf32>, vector<8x64xf32> -> vector<8x64xf32>
    %151 = arith.addf %146, %150 : vector<8x64xf32>
    %152 = vector.extract_strided_slice %8 {offsets = [208, 0], sizes = [8, 64], strides = [1, 1]} : vector<288x64xf32> to vector<8x64xf32>
    %c8_111 = arith.constant 8 : index
    %c0_112 = arith.constant 0 : index
    %c0_113 = arith.constant 0 : index
    %153 = vector.load %arg4[%c8_111, %c0_112, %c0_113] : memref<9x64x64xf32, #tpu.memory_space<vmem>>, vector<1x64x64xf32>
    %154 = vector.shape_cast %153 : vector<1x64x64xf32> to vector<64x64xf32>
    %cst_114 = arith.constant dense<0.000000e+00> : vector<8x64xf32>
    %155 = tpu.matmul %152, %154, %cst_114 {dimension_numbers = #tpu.dot_dimension_numbers<[1], [0], [0], [1], [0, 0, 1, 1], [], []>} : vector<8x64xf32>, vector<64x64xf32>, vector<8x64xf32> -> vector<8x64xf32>
    %156 = arith.addf %151, %155 : vector<8x64xf32>
    %c0_115 = arith.constant 0 : index
    %c0_116 = arith.constant 0 : index
    %157 = vector.load %arg5[%c0_115, %c0_116] : memref<1x64xf32, #tpu.memory_space<vmem>>, vector<1x64xf32>
    %158 = vector.broadcast %157 : vector<1x64xf32> to vector<8x64xf32>
    %159 = arith.addf %156, %158 : vector<8x64xf32>
    %cst_117 = arith.constant 0.000000e+00 : f32
    %160 = vector.broadcast %cst_117 : f32 to vector<8x64xf32>
    %161 = arith.maximumf %159, %160 : vector<8x64xf32>
    %cst_118 = arith.constant 0.000000e+00 : f32
    %162 = vector.broadcast %cst_118 : f32 to vector<8x64xf32>
    %163 = vector.extract_strided_slice %8 {offsets = [112, 0], sizes = [8, 64], strides = [1, 1]} : vector<288x64xf32> to vector<8x64xf32>
    %c0_119 = arith.constant 0 : index
    %c0_120 = arith.constant 0 : index
    %c0_121 = arith.constant 0 : index
    %164 = vector.load %arg4[%c0_119, %c0_120, %c0_121] : memref<9x64x64xf32, #tpu.memory_space<vmem>>, vector<1x64x64xf32>
    %165 = vector.shape_cast %164 : vector<1x64x64xf32> to vector<64x64xf32>
    %cst_122 = arith.constant dense<0.000000e+00> : vector<8x64xf32>
    %166 = tpu.matmul %163, %165, %cst_122 {dimension_numbers = #tpu.dot_dimension_numbers<[1], [0], [0], [1], [0, 0, 1, 1], [], []>} : vector<8x64xf32>, vector<64x64xf32>, vector<8x64xf32> -> vector<8x64xf32>
    %167 = arith.addf %162, %166 : vector<8x64xf32>
    %168 = vector.extract_strided_slice %8 {offsets = [120, 0], sizes = [8, 64], strides = [1, 1]} : vector<288x64xf32> to vector<8x64xf32>
    %c1_123 = arith.constant 1 : index
    %c0_124 = arith.constant 0 : index
    %c0_125 = arith.constant 0 : index
    %169 = vector.load %arg4[%c1_123, %c0_124, %c0_125] : memref<9x64x64xf32, #tpu.memory_space<vmem>>, vector<1x64x64xf32>
    %170 = vector.shape_cast %169 : vector<1x64x64xf32> to vector<64x64xf32>
    %cst_126 = arith.constant dense<0.000000e+00> : vector<8x64xf32>
    %171 = tpu.matmul %168, %170, %cst_126 {dimension_numbers = #tpu.dot_dimension_numbers<[1], [0], [0], [1], [0, 0, 1, 1], [], []>} : vector<8x64xf32>, vector<64x64xf32>, vector<8x64xf32> -> vector<8x64xf32>
    %172 = arith.addf %167, %171 : vector<8x64xf32>
    %173 = vector.extract_strided_slice %8 {offsets = [128, 0], sizes = [8, 64], strides = [1, 1]} : vector<288x64xf32> to vector<8x64xf32>
    %c2_127 = arith.constant 2 : index
    %c0_128 = arith.constant 0 : index
    %c0_129 = arith.constant 0 : index
    %174 = vector.load %arg4[%c2_127, %c0_128, %c0_129] : memref<9x64x64xf32, #tpu.memory_space<vmem>>, vector<1x64x64xf32>
    %175 = vector.shape_cast %174 : vector<1x64x64xf32> to vector<64x64xf32>
    %cst_130 = arith.constant dense<0.000000e+00> : vector<8x64xf32>
    %176 = tpu.matmul %173, %175, %cst_130 {dimension_numbers = #tpu.dot_dimension_numbers<[1], [0], [0], [1], [0, 0, 1, 1], [], []>} : vector<8x64xf32>, vector<64x64xf32>, vector<8x64xf32> -> vector<8x64xf32>
    %177 = arith.addf %172, %176 : vector<8x64xf32>
    %178 = vector.extract_strided_slice %8 {offsets = [160, 0], sizes = [8, 64], strides = [1, 1]} : vector<288x64xf32> to vector<8x64xf32>
    %c3_131 = arith.constant 3 : index
    %c0_132 = arith.constant 0 : index
    %c0_133 = arith.constant 0 : index
    %179 = vector.load %arg4[%c3_131, %c0_132, %c0_133] : memref<9x64x64xf32, #tpu.memory_space<vmem>>, vector<1x64x64xf32>
    %180 = vector.shape_cast %179 : vector<1x64x64xf32> to vector<64x64xf32>
    %cst_134 = arith.constant dense<0.000000e+00> : vector<8x64xf32>
    %181 = tpu.matmul %178, %180, %cst_134 {dimension_numbers = #tpu.dot_dimension_numbers<[1], [0], [0], [1], [0, 0, 1, 1], [], []>} : vector<8x64xf32>, vector<64x64xf32>, vector<8x64xf32> -> vector<8x64xf32>
    %182 = arith.addf %177, %181 : vector<8x64xf32>
    %183 = vector.extract_strided_slice %8 {offsets = [168, 0], sizes = [8, 64], strides = [1, 1]} : vector<288x64xf32> to vector<8x64xf32>
    %c4_135 = arith.constant 4 : index
    %c0_136 = arith.constant 0 : index
    %c0_137 = arith.constant 0 : index
    %184 = vector.load %arg4[%c4_135, %c0_136, %c0_137] : memref<9x64x64xf32, #tpu.memory_space<vmem>>, vector<1x64x64xf32>
    %185 = vector.shape_cast %184 : vector<1x64x64xf32> to vector<64x64xf32>
    %cst_138 = arith.constant dense<0.000000e+00> : vector<8x64xf32>
    %186 = tpu.matmul %183, %185, %cst_138 {dimension_numbers = #tpu.dot_dimension_numbers<[1], [0], [0], [1], [0, 0, 1, 1], [], []>} : vector<8x64xf32>, vector<64x64xf32>, vector<8x64xf32> -> vector<8x64xf32>
    %187 = arith.addf %182, %186 : vector<8x64xf32>
    %188 = vector.extract_strided_slice %8 {offsets = [176, 0], sizes = [8, 64], strides = [1, 1]} : vector<288x64xf32> to vector<8x64xf32>
    %c5_139 = arith.constant 5 : index
    %c0_140 = arith.constant 0 : index
    %c0_141 = arith.constant 0 : index
    %189 = vector.load %arg4[%c5_139, %c0_140, %c0_141] : memref<9x64x64xf32, #tpu.memory_space<vmem>>, vector<1x64x64xf32>
    %190 = vector.shape_cast %189 : vector<1x64x64xf32> to vector<64x64xf32>
    %cst_142 = arith.constant dense<0.000000e+00> : vector<8x64xf32>
    %191 = tpu.matmul %188, %190, %cst_142 {dimension_numbers = #tpu.dot_dimension_numbers<[1], [0], [0], [1], [0, 0, 1, 1], [], []>} : vector<8x64xf32>, vector<64x64xf32>, vector<8x64xf32> -> vector<8x64xf32>
    %192 = arith.addf %187, %191 : vector<8x64xf32>
    %193 = vector.extract_strided_slice %8 {offsets = [208, 0], sizes = [8, 64], strides = [1, 1]} : vector<288x64xf32> to vector<8x64xf32>
    %c6_143 = arith.constant 6 : index
    %c0_144 = arith.constant 0 : index
    %c0_145 = arith.constant 0 : index
    %194 = vector.load %arg4[%c6_143, %c0_144, %c0_145] : memref<9x64x64xf32, #tpu.memory_space<vmem>>, vector<1x64x64xf32>
    %195 = vector.shape_cast %194 : vector<1x64x64xf32> to vector<64x64xf32>
    %cst_146 = arith.constant dense<0.000000e+00> : vector<8x64xf32>
    %196 = tpu.matmul %193, %195, %cst_146 {dimension_numbers = #tpu.dot_dimension_numbers<[1], [0], [0], [1], [0, 0, 1, 1], [], []>} : vector<8x64xf32>, vector<64x64xf32>, vector<8x64xf32> -> vector<8x64xf32>
    %197 = arith.addf %192, %196 : vector<8x64xf32>
    %198 = vector.extract_strided_slice %8 {offsets = [216, 0], sizes = [8, 64], strides = [1, 1]} : vector<288x64xf32> to vector<8x64xf32>
    %c7_147 = arith.constant 7 : index
    %c0_148 = arith.constant 0 : index
    %c0_149 = arith.constant 0 : index
    %199 = vector.load %arg4[%c7_147, %c0_148, %c0_149] : memref<9x64x64xf32, #tpu.memory_space<vmem>>, vector<1x64x64xf32>
    %200 = vector.shape_cast %199 : vector<1x64x64xf32> to vector<64x64xf32>
    %cst_150 = arith.constant dense<0.000000e+00> : vector<8x64xf32>
    %201 = tpu.matmul %198, %200, %cst_150 {dimension_numbers = #tpu.dot_dimension_numbers<[1], [0], [0], [1], [0, 0, 1, 1], [], []>} : vector<8x64xf32>, vector<64x64xf32>, vector<8x64xf32> -> vector<8x64xf32>
    %202 = arith.addf %197, %201 : vector<8x64xf32>
    %203 = vector.extract_strided_slice %8 {offsets = [224, 0], sizes = [8, 64], strides = [1, 1]} : vector<288x64xf32> to vector<8x64xf32>
    %c8_151 = arith.constant 8 : index
    %c0_152 = arith.constant 0 : index
    %c0_153 = arith.constant 0 : index
    %204 = vector.load %arg4[%c8_151, %c0_152, %c0_153] : memref<9x64x64xf32, #tpu.memory_space<vmem>>, vector<1x64x64xf32>
    %205 = vector.shape_cast %204 : vector<1x64x64xf32> to vector<64x64xf32>
    %cst_154 = arith.constant dense<0.000000e+00> : vector<8x64xf32>
    %206 = tpu.matmul %203, %205, %cst_154 {dimension_numbers = #tpu.dot_dimension_numbers<[1], [0], [0], [1], [0, 0, 1, 1], [], []>} : vector<8x64xf32>, vector<64x64xf32>, vector<8x64xf32> -> vector<8x64xf32>
    %207 = arith.addf %202, %206 : vector<8x64xf32>
    %c0_155 = arith.constant 0 : index
    %c0_156 = arith.constant 0 : index
    %208 = vector.load %arg5[%c0_155, %c0_156] : memref<1x64xf32, #tpu.memory_space<vmem>>, vector<1x64xf32>
    %209 = vector.broadcast %208 : vector<1x64xf32> to vector<8x64xf32>
    %210 = arith.addf %207, %209 : vector<8x64xf32>
    %cst_157 = arith.constant 0.000000e+00 : f32
    %211 = vector.broadcast %cst_157 : f32 to vector<8x64xf32>
    %212 = arith.maximumf %210, %211 : vector<8x64xf32>
    %213 = tpu.concatenate %59, %110, %161, %212 in 1 : vector<8x64xf32>, vector<8x64xf32>, vector<8x64xf32>, vector<8x64xf32> -> vector<8x256xf32>
    %c0_158 = arith.constant 0 : index
    %c0_159 = arith.constant 0 : index
    %214 = vector.load %arg6[%c0_158, %c0_159] : memref<256x128xf32, #tpu.memory_space<vmem>>, vector<256x128xf32>
    %cst_160 = arith.constant dense<0.000000e+00> : vector<8x128xf32>
    %215 = tpu.matmul %213, %214, %cst_160 {dimension_numbers = #tpu.dot_dimension_numbers<[1], [0], [0], [1], [0, 0, 1, 1], [], []>} : vector<8x256xf32>, vector<256x128xf32>, vector<8x128xf32> -> vector<8x128xf32>
    %c0_161 = arith.constant 0 : index
    %c0_162 = arith.constant 0 : index
    %216 = vector.load %arg7[%c0_161, %c0_162] : memref<1x128xf32, #tpu.memory_space<vmem>>, vector<1x128xf32>
    %217 = vector.broadcast %216 : vector<1x128xf32> to vector<8x128xf32>
    %218 = arith.addf %215, %217 : vector<8x128xf32>
    %c0_163 = arith.constant 0 : index
    %c0_164 = arith.constant 0 : index
    %219 = vector.load %arg8[%c0_163, %c0_164] : memref<8x128xf32, #tpu.memory_space<vmem>>, vector<8x128xf32>
    tpu.vector_store %arg8[%c0_163, %c0_164], %218 {strides = array<i32>} : memref<8x128xf32, #tpu.memory_space<vmem>>, vector<8x128xf32>,
    return
  }
  func.func @transform_0(%arg0: i32) -> (i32, i32) {
    %c0_i32 = arith.constant 0 : i32
    %c0_i32_0 = arith.constant 0 : i32
    return %arg0, %c0_i32 : i32, i32
  }
  func.func @transform_1(%arg0: i32) -> (i32, i32) {
    %c0_i32 = arith.constant 0 : i32
    %c0_i32_0 = arith.constant 0 : i32
    %c0_i32_1 = arith.constant 0 : i32
    return %c0_i32, %c0_i32_0 : i32, i32
  }
  func.func @transform_2(%arg0: i32) -> (i32, i32) {
    %c0_i32 = arith.constant 0 : i32
    %c0_i32_0 = arith.constant 0 : i32
    %c0_i32_1 = arith.constant 0 : i32
    return %c0_i32, %c0_i32_0 : i32, i32
  }
  func.func @transform_3(%arg0: i32) -> (i32, i32, i32) {
    %c0_i32 = arith.constant 0 : i32
    %c0_i32_0 = arith.constant 0 : i32
    %c0_i32_1 = arith.constant 0 : i32
    %c0_i32_2 = arith.constant 0 : i32
    return %c0_i32, %c0_i32_0, %c0_i32_1 : i32, i32, i32
  }
  func.func @transform_4(%arg0: i32) -> (i32, i32) {
    %c0_i32 = arith.constant 0 : i32
    %c0_i32_0 = arith.constant 0 : i32
    %c0_i32_1 = arith.constant 0 : i32
    return %c0_i32, %c0_i32_0 : i32, i32
  }
  func.func @transform_5(%arg0: i32) -> (i32, i32) {
    %c0_i32 = arith.constant 0 : i32
    %c0_i32_0 = arith.constant 0 : i32
    %c0_i32_1 = arith.constant 0 : i32
    return %c0_i32, %c0_i32_0 : i32, i32
  }
  func.func @transform_6(%arg0: i32) -> (i32, i32) {
    %c0_i32 = arith.constant 0 : i32
    %c0_i32_0 = arith.constant 0 : i32
    %c0_i32_1 = arith.constant 0 : i32
    return %c0_i32, %c0_i32_0 : i32, i32
  }
  func.func @transform_7(%arg0: i32) -> (i32, i32) {
    %c0_i32 = arith.constant 0 : i32
    %c0_i32_0 = arith.constant 0 : i32
    return %arg0, %c0_i32 : i32, i32
  }
}

</mosaic_0001>

<bundles_post_ra>
// kernel: model_forward.1
= control target key start
LH: loop header
LB: loop body
LE: loop exit
PB: predicated region body
PF: predicated region fallthrough
CT: control target
= control target key end

     0   :  { %s5559_s24 = smov 0   ;;  %s6623_s0 = inlined_call_operand.vmem [shape: u8[576,100], index: 0, kind: input, shape index: {}]   ;;  %s6624_s1 = inlined_call_operand.vmem [shape: f32[100,64], index: 1, kind: input, shape index: {}]   ;;  %s6625_s2 = inlined_call_operand.vmem [shape: f32[1,64], index: 2, kind: input, shape index: {}]   ;;  %s6626_s3 = inlined_call_operand.vmem [shape: f32[9,64,64], index: 3, kind: input, shape index: {}]   ;;  %s6627_s4 = inlined_call_operand.vmem [shape: f32[1,64], index: 4, kind: input, shape index: {}]   ;;  %s6628_s5 = inlined_call_operand.vmem [shape: f32[256,128], index: 5, kind: input, shape index: {}]   ;;  %s6629_s6 = inlined_call_operand.vmem [shape: f32[1,128], index: 6, kind: input, shape index: {}]   ;;  %s6630_s7 = inlined_call_operand.vmem [shape: f32[16,128], index: 7, kind: output, shape index: {}]  }
   0x1 LB: > { %s5565_s25 = sadd.s32 4294967295, %s5513_s24   ;;  %p3684_p0 = scmp.ge.s32.totalorder %s5513_s24, 1  ;;  %s5513_s24 = sphi %s5559_s24, %s17_s24  }
   0x2   : > { %p238_p1 = scmp.lt.s32.totalorder %s5513_s24, 3 }
   0x4   : > { %p239_p2 = pnand %p3684_p0, %p238_p1 }
   0x5   : > { %v396_v0 = vld [vmem:[%s6624_s1] sm:$0xff] (!%p239_p2)  ;;  %v397_v1 = vld [vmem:[%s6624_s1 + $0x8] sm:$0xff] (!%p239_p2)  ;;  %v398_v2 = vld [vmem:[%s6624_s1 + $0x10] sm:$0xff] (!%p239_p2)  ;;  %s269_s9 = smul.u32 (!%p239_p2), 9, %s5565_s25  ;;  %v5515_v8 = vmov (!%p239_p2), 0.0|0.0   ;;  %vm416_vm0 = vcmask (!%p239_p2), 818176  }
   0x6   : > { %242 = sbr.rel (%p239_p2) target bundleno = 1143 (0x477), region = 48  ;;  %v5001_v3 = vpack.c.bf16 (!%p239_p2), %v397_v1, %v396_v0  ;;  %v399_v4 = vld [vmem:[%s6624_s1 + $0x18] sm:$0xff] (!%p239_p2)  ;;  %v400_v6 = vld [vmem:[%s6624_s1 + $0x20] sm:$0xff] (!%p239_p2)  ;;  %v401_v7 = vld [vmem:[%s6624_s1 + $0x28] sm:$0xff] (!%p239_p2)  ;;  %5025 = vmatprep.subr.bf16.mxu1 (!%p239_p2), %v5515_v8  ;;  %vm525_vm1 = vcmask (!%p239_p2), 1043456   ;;  %vm5516_vm2 = vmmov (!%p239_p2), 0  }
   0x7   : > { %v5005_v5 = vpack.c.bf16 (!%p239_p2), %v399_v4, %v398_v2  ;;  %p270_p3 = scmp.lt.s32.totalorder (!%p239_p2), %s269_s9, 17  ;;  %v3725_v9 = vld [vmem:[%s6626_s3 + $0x40] sm:$0xff] (!%p239_p2)  ;;  %v3726_v10 = vld [vmem:[%s6626_s3 + $0x48] sm:$0xff] (!%p239_p2)  ;;  %v5009_v11 = vpack.c.bf16 (!%p239_p2), %v401_v7, %v400_v6  ;;  %v3727_v13 = vld [vmem:[%s6626_s3 + $0x50] sm:$0xff] (!%p239_p2)  ;;  %vm805_vm3 = vcmask (!%p239_p2), 523264   ;;  %s5518_s17 = smov (!%p239_p2), 64  }
   0x8   : > { %5002 = vmatprep.subr.bf16.mxu0 (!%p239_p2), %v5001_v3  ;;  %v5595_v12 = vpack.c.bf16 (!%p239_p2), %v3726_v10, %v3725_v9  ;;  %v3728_v14 = vld [vmem:[%s6626_s3 + $0x58] sm:$0xff] (!%p239_p2)  ;;  %v402_v15 = vld [vmem:[%s6624_s1 + $0x30] sm:$0xff] (!%p239_p2)  ;;  %v3729_v19 = vld [vmem:[%s6626_s3 + $0x60] sm:$0xff] (!%p239_p2)  ;;  %p275_p4 = scmp.lt.s32.totalorder (!%p239_p2), %s5565_s25, 1 }
   0x9   : > { %5004 = vmatpush3.bf16.msra.mxu0 (!%p239_p2), %v5001_v3  ;;  %v403_v16 = vld [vmem:[%s6624_s1 + $0x38] sm:$0xff] (!%p239_p2)  ;;  %v5615_v17 = vpack.c.bf16 (!%p239_p2), %v3728_v14, %v3727_v13  ;;  %v3730_v20 = vld [vmem:[%s6626_s3 + $0x68] sm:$0xff] (!%p239_p2)  ;;  %v404_v23 = vld [vmem:[%s6624_s1 + $0x40] sm:$0xff] (!%p239_p2) }
   0xa   : > { %5006 = vmatprep.subr.bf16.mxu0 (!%p239_p2), %v5005_v5  ;;  %5027 = vmatpush3.bf16.msra.mxu1 (!%p239_p2), %v5595_v12  ;;  %v5013_v21 = vpack.c.bf16 (!%p239_p2), %v403_v16, %v402_v15  ;;  %v405_v24 = vld [vmem:[%s6624_s1 + $0x48] sm:$0xff] (!%p239_p2)  ;;  %v5632_v26 = vpack.c.bf16 (!%p239_p2), %v3730_v20, %v3729_v19  ;;  %v406_v29 = vld [vmem:[%s6624_s1 + $0x50] sm:$0xff] (!%p239_p2)  ;;  %v407_v30 = vld [vmem:[%s6624_s1 + $0x58] sm:$0xff] (!%p239_p2) }
   0xb   : > { %5028 = vmatprep.subr.bf16.mxu1 (!%p239_p2), %v5515_v8  ;;  %v5017_v27 = vpack.c.bf16 (!%p239_p2), %v405_v24, %v404_v23  ;;  %v5021_v31 = vpack.c.bf16 (!%p239_p2), %v407_v30, %v406_v29  ;;  %v408_v37 = vld [vmem:[%s6624_s1 + $0x60] sm:$0xf] (!%p239_p2) }
   0xd   : > { %s6634_s9 = smov (!%p270_p3, %s269_s9), 17  ;;  %5008 = vmatpush3.bf16.msra.mxu0 %v5005_v5  ;;  %s6636_s25 = smov (!%p275_p4, %s5565_s25), 1 }
   0xe   : > { %s3685_s30 = sshll.u32 %s6634_s9, 3  ;;  %5010 = vmatprep.subr.bf16.mxu0 %v5009_v11  ;;  %5030 = vmatpush3.bf16.msra.mxu1 %v5615_v17  ;;  %s3686_s18 = sshll.u32 %s6636_s25, 3 }
   0xf   : > { %s5612_s11 = scalar_lea.vmem %s6623_s0, %s3685_s30  ;;  %5031 = vmatprep.subr.bf16.mxu1 %v5515_v8  ;;  %s278_s23 = scalar_lea.vmem %s6630_s7, %s3686_s18 }
  0x10   : > { %v279_v18 = vld [vmem:[%s5612_s11] sm:$0xff]  ;;  %v280_v34 = vld [vmem:[%s5612_s11 + $0x8] sm:$0xff]  ;;  %v281_v46 = vld [vmem:[%s5612_s11 + $0x10] sm:$0xff] }
  0x11   : > { %v288_v22 = vunpack.c.0.s8 %v279_v18  ;;  %5012 = vmatpush3.bf16.msra.mxu0 %v5009_v11  ;;  %v289_v32 = vunpack.c.1.s8 %v279_v18  ;;  %v290_v33 = vunpack.c.2.s8 %v279_v18  ;;  %v291_v36 = vunpack.c.3.s8 %v279_v18  ;;  %v282_v59 = vld [vmem:[%s5612_s11 + $0x18] sm:$0xff]  ;;  %v283_v9 = vld [vmem:[%s5612_s11 + $0x20] sm:$0xff]  ;;  %v284_v24 = vld [vmem:[%s5612_s11 + $0x28] sm:$0xff] }
  0x12   : > { %5014 = vmatprep.subr.bf16.mxu0 %v5013_v21  ;;  %5033 = vmatpush3.bf16.msra.mxu1 %v5632_v26  ;;  %v292_v39 = vunpack.c.0.s8 %v280_v34  ;;  %v293_v42 = vunpack.c.1.s8 %v280_v34  ;;  %v294_v45 = vunpack.c.2.s8 %v280_v34  ;;  %v295_v49 = vunpack.c.3.s8 %v280_v34 }
  0x13   : > { %v324_v25 = vand.u32 255, %v288_v22  ;;  %5034 = vmatprep.subr.bf16.mxu1 %v5515_v8  ;;  %v325_v35 = vand.u32 255, %v289_v32  ;;  %v326_v38 = vand.u32 255, %v290_v33  ;;  %v327_v41 = vand.u32 255, %v291_v36 }
  0x14   : > { %v328_v44 = vand.u32 255, %v292_v39  ;;  %v329_v48 = vand.u32 255, %v293_v42  ;;  %v330_v51 = vand.u32 255, %v294_v45  ;;  %v296_v52 = vunpack.c.0.s8 %v281_v46 }
  0x15   : > { %v360_v28 = vcvt.s32.f32 %v324_v25  ;;  %5016 = vmatpush3.bf16.msra.mxu0 %v5013_v21  ;;  %v361_v40 = vcvt.s32.f32 %v325_v35  ;;  %v362_v43 = vcvt.s32.f32 %v326_v38  ;;  %v363_v47 = vcvt.s32.f32 %v327_v41  ;;  %v285_v38 = vld [vmem:[%s5612_s11 + $0x30] sm:$0xff] }
  0x16   : > { %5018 = vmatprep.subr.bf16.mxu0 %v5017_v27  ;;  %v364_v50 = vcvt.s32.f32 %v328_v44  ;;  %v365_v53 = vcvt.s32.f32 %v329_v48  ;;  %v331_v54 = vand.u32 255, %v295_v49  ;;  %v297_v55 = vunpack.c.1.s8 %v281_v46 }
  0x17   : > { %4263 = vmatprep.mubr.msk.f32.mxu0 %vm416_vm0, %v360_v28  ;;  %v366_v56 = vcvt.s32.f32 %v330_v51  ;;  %v332_v57 = vand.u32 255, %v296_v52  ;;  %v298_v58 = vunpack.c.2.s8 %v281_v46  ;;  %v299_v62 = vunpack.c.3.s8 %v281_v46 }
  0x18   : > { %v367_v60 = vcvt.s32.f32 %v331_v54  ;;  %v333_v61 = vand.u32 255, %v297_v55  ;;  %v300_v1 = vunpack.c.0.s8 %v282_v59  ;;  %v301_v4 = vunpack.c.1.s8 %v282_v59 }
  0x19   : > { %5020 = vmatpush3.bf16.msra.mxu0 %v5017_v27  ;;  %v368_v63 = vcvt.s32.f32 %v332_v57  ;;  %v334_v0 = vand.u32 255, %v298_v58  ;;  %v335_v3 = vand.u32 255, %v299_v62  ;;  %v302_v7 = vunpack.c.2.s8 %v282_v59 }
  0x1a   : > { %5022 = vmatprep.subr.bf16.mxu0 %v5021_v31  ;;  %v369_v2 = vcvt.s32.f32 %v333_v61  ;;  %v336_v6 = vand.u32 255, %v300_v1  ;;  %v337_v11 = vand.u32 255, %v301_v4  ;;  %v303_v13 = vunpack.c.3.s8 %v282_v59  ;;  %v3732_v61 = vld [vmem:[%s6626_s3 + $0x78] sm:$0xff] }
  0x1b   : > { %v370_v5 = vcvt.s32.f32 %v334_v0  ;;  %v371_v10 = vcvt.s32.f32 %v335_v3  ;;  %v338_v15 = vand.u32 255, %v302_v7  ;;  %v304_v16 = vunpack.c.0.s8 %v283_v9  ;;  %v286_v0 = vld [vmem:[%s5612_s11 + $0x38] sm:$0xff]  ;;  %v3790_v7 = vld [vmem:[%s6626_s3 + $0x208] sm:$0xff] }
  0x1c   : > { %v372_v14 = vcvt.s32.f32 %v336_v6  ;;  %v373_v18 = vcvt.s32.f32 %v337_v11  ;;  %v339_v19 = vand.u32 255, %v303_v13  ;;  %v305_v20 = vunpack.c.1.s8 %v283_v9  ;;  %v3789_v6 = vld [vmem:[%s6626_s3 + $0x200] sm:$0xff] }
  0x1d   : > { %5024 = vmatpush3.bf16.msra.mxu0 %v5021_v31  ;;  %v374_v21 = vcvt.s32.f32 %v338_v15  ;;  %v340_v22 = vand.u32 255, %v304_v16  ;;  %v306_v23 = vunpack.c.2.s8 %v283_v9  ;;  %v307_v28 = vunpack.c.3.s8 %v283_v9  ;;  %v287_v16 = vld [vmem:[%s5612_s11 + $0x40] sm:$0xff] }
  0x1e   : > { %4261 = vmatprep.subr.msk.mxu0 %vm525_vm1, %v408_v37  ;;  %v375_v25 = vcvt.s32.f32 %v339_v19  ;;  %v341_v27 = vand.u32 255, %v305_v20  ;;  %v308_v31 = vunpack.c.0.s8 %v284_v24  ;;  %v309_v34 = vunpack.c.1.s8 %v284_v24  ;;  %v3791_v19 = vld [vmem:[%s6626_s3 + $0x210] sm:$0xff]  ;;  %v3792_v20 = vld [vmem:[%s6626_s3 + $0x218] sm:$0xff] }
  0x1f   : > { %v376_v29 = vcvt.s32.f32 %v340_v22  ;;  %v342_v30 = vand.u32 255, %v306_v23  ;;  %v343_v33 = vand.u32 255, %v307_v28  ;;  %v311_v41 = vunpack.c.3.s8 %v284_v24 }
  0x20   : > { %v377_v32 = vcvt.s32.f32 %v341_v27  ;;  %v344_v36 = vand.u32 255, %v308_v31  ;;  %v312_v44 = vunpack.c.0.s8 %v285_v38  ;;  %v316_v1 = vunpack.c.0.s8 %v286_v0 }
  0x21   : > { %4262 = vmatpush3.msk.msra.mxu0 %vm525_vm1, %v408_v37  ;;  %v378_v35 = vcvt.s32.f32 %v342_v30  ;;  %v310_v37 = vunpack.c.2.s8 %v284_v24  ;;  %v379_v39 = vcvt.s32.f32 %v343_v33  ;;  %v347_v46 = vand.u32 255, %v311_v41  ;;  %v3794_v30 = vld [vmem:[%s6626_s3 + $0x228] sm:$0xff] }
  0x22   : > { %4264 = vmatmul.mubr.msk.f32.vlgmr.msra.gmra.mrb[0].mxu0 %vm416_vm0, %v361_v40  ;;  %5121 = vmatprep.subr.bf16.mxu0 %v5515_v8  ;;  %v345_v40 = vand.u32 255, %v309_v34  ;;  %v380_v42 = vcvt.s32.f32 %v344_v36  ;;  %v348_v49 = vand.u32 255, %v312_v44  ;;  %v352_v3 = vand.u32 255, %v316_v1  ;;  %v789_v44 = vld [vmem:[%s6626_s3 + $0x8] sm:$0xff] }
  0x23   : > { %4266 = vmatprep.mubr.msk.f32.mxu0 %vm416_vm0, %v362_v43  ;;  %v346_v43 = vand.u32 255, %v310_v37  ;;  %v383_v51 = vcvt.s32.f32 %v347_v46  ;;  %v318_v9 = vunpack.c.2.s8 %v286_v0  ;;  %v5700_v11 = vpack.c.bf16 %v3790_v7, %v3789_v6 }
  0x24   : > { %v381_v45 = vcvt.s32.f32 %v345_v40  ;;  %v384_v54 = vcvt.s32.f32 %v348_v49  ;;  %v319_v13 = vunpack.c.3.s8 %v286_v0  ;;  %v5713_v23 = vpack.c.bf16 %v3792_v20, %v3791_v19  ;;  %v3739_v19 = vld [vmem:[%s6626_s3 + $0xa0] sm:$0xff]  ;;  %v3740_v20 = vld [vmem:[%s6626_s3 + $0xa8] sm:$0xff] }
  0x25   : > { %v382_v48 = vcvt.s32.f32 %v346_v43  ;;  %5123 = vmatpush3.bf16.msra.mxu0 %v5700_v11  ;;  %v321_v24 = vunpack.c.1.s8 %v287_v16  ;;  %v322_v31 = vunpack.c.2.s8 %v287_v16  ;;  %v323_v34 = vunpack.c.3.s8 %v287_v16  ;;  %v788_v43 = vld [vmem:[%s6626_s3] sm:$0xff] }
  0x26   : > { %4267 = vmatmul.mubr.msk.f32.gmra.mrb[2].mxu0 %vm416_vm0, %v363_v47  ;;  %v313_v47 = vunpack.c.1.s8 %v285_v38  ;;  %v355_v15 = vand.u32 255, %v319_v13  ;;  %5124 = vmatprep.subr.bf16.mxu0 %v5515_v8  ;;  %v3737_v13 = vld [vmem:[%s6626_s3 + $0x90] sm:$0xff] }
  0x27   : > { %4269 = vmatprep.mubr.msk.f32.mxu0 %vm416_vm0, %v364_v50  ;;  %v314_v50 = vunpack.c.2.s8 %v285_v38  ;;  %v357_v27 = vand.u32 255, %v321_v24  ;;  %v359_v36 = vand.u32 255, %v323_v34  ;;  %v5841_v24 = vpack.c.bf16 %v3740_v20, %v3739_v19  ;;  %v3744_v34 = vld [vmem:[%s6626_s3 + $0xc0] sm:$0xff]  ;;  %v3755_v19 = vld [vmem:[%s6626_s3 + $0x110] sm:$0xff]  ;;  %v3756_v20 = vld [vmem:[%s6626_s3 + $0x118] sm:$0xff] }
  0x28   : > { %v349_v52 = vand.u32 255, %v313_v47  ;;  %v391_v22 = vcvt.s32.f32 %v355_v15 }
  0x29   : > { %v350_v55 = vand.u32 255, %v314_v50  ;;  %5126 = vmatpush3.bf16.msra.mxu0 %v5713_v23  ;;  %v395_v40 = vcvt.s32.f32 %v359_v36  ;;  %v790_v50 = vld [vmem:[%s6626_s3 + $0x10] sm:$0xff] }
  0x2a   : > { %4270 = vmatmul.mubr.msk.f32.gmra.mrb[4].mxu0 %vm416_vm0, %v365_v53  ;;  %v315_v53 = vunpack.c.3.s8 %v285_v38  ;;  %5127 = vmatprep.subr.bf16.mxu0 %v5515_v8  ;;  %v3795_v38 = vld [vmem:[%s6626_s3 + $0x230] sm:$0xff] }
  0x2b   : > { %4272 = vmatprep.mubr.msk.f32.mxu0 %vm416_vm0, %v366_v56  ;;  %v385_v56 = vcvt.s32.f32 %v349_v52  ;;  %v386_v58 = vcvt.s32.f32 %v350_v55  ;;  %v792_v55 = vld [vmem:[%s6626_s3 + $0x20] sm:$0xff] }
  0x2c   : > { %v351_v57 = vand.u32 255, %v315_v53 }
  0x2e   : > { %4273 = vmatmul.mubr.msk.f32.gmra.mrb[6].mxu0 %vm416_vm0, %v367_v60  ;;  %v387_v59 = vcvt.s32.f32 %v351_v57  ;;  %v3731_v60 = vld [vmem:[%s6626_s3 + $0x70] sm:$0xff] }
  0x2f   : > { %4275 = vmatprep.mubr.msk.f32.mxu0 %vm416_vm0, %v368_v63  ;;  %v5687_v62 = vpack.c.bf16 %v3732_v61, %v3731_v60  ;;  %v5517_v63 = vmov 0.0   ;;  %v794_v60 = vld [vmem:[%s6626_s3 + $0x30] sm:$0xff]  ;;  %v795_v61 = vld [vmem:[%s6626_s3 + $0x38] sm:$0xff] }
  0x30   : > { %4333 = vmatprep.mubr.msk.f32.mxu1 %vm5516_vm2, %v5517_v63 }
  0x31   : > { %5036 = vmatpush3.bf16.msra.mxu1 %v5687_v62 }
  0x32   : > { %4276 = vmatmul.mubr.msk.f32.gmra.mrb[8].mxu0 %vm416_vm0, %v369_v2  ;;  %5037 = vmatprep.subr.bf16.mxu1 %v5515_v8  ;;  %v317_v2 = vunpack.c.1.s8 %v286_v0 }
  0x33   : > { %4278 = vmatprep.mubr.msk.f32.mxu0 %vm416_vm0, %v370_v5  ;;  %v388_v5 = vcvt.s32.f32 %v352_v3 }
  0x34   : > { %v353_v4 = vand.u32 255, %v317_v2  ;;  %v5797_v2 = vpack.c.bf16 %v795_v61, %v794_v60 }
  0x36   : > { %4279 = vmatmul.mubr.msk.f32.gmra.mrb[10].mxu0 %vm416_vm0, %v371_v10  ;;  %v389_v10 = vcvt.s32.f32 %v353_v4  ;;  %v3735_v4 = vld [vmem:[%s6626_s3 + $0x80] sm:$0xff] }
  0x37   : > { %4281 = vmatprep.mubr.msk.f32.mxu0 %vm416_vm0, %v372_v14  ;;  %v354_v14 = vand.u32 255, %v318_v9 }
  0x3a   : > { %4282 = vmatmul.mubr.msk.f32.gmra.mrb[12].mxu0 %vm416_vm0, %v373_v18  ;;  %v390_v18 = vcvt.s32.f32 %v354_v14  ;;  %v3738_v14 = vld [vmem:[%s6626_s3 + $0x98] sm:$0xff] }
  0x3b   : > { %4284 = vmatprep.mubr.msk.f32.mxu0 %vm416_vm0, %v374_v21  ;;  %v320_v21 = vunpack.c.0.s8 %v287_v16 }
  0x3e   : > { %4285 = vmatmul.mubr.msk.f32.gmra.mrb[14].mxu0 %vm416_vm0, %v375_v25  ;;  %v356_v25 = vand.u32 255, %v320_v21 }
  0x3f   : > { %4287 = vmatprep.mubr.msk.f32.mxu0 %vm416_vm0, %v376_v29  ;;  %v3793_v29 = vld [vmem:[%s6626_s3 + $0x220] sm:$0xff] }
  0x40   : > { %v392_v28 = vcvt.s32.f32 %v356_v25  ;;  %v5725_v33 = vpack.c.bf16 %v3794_v30, %v3793_v29  ;;  %v3741_v25 = vld [vmem:[%s6626_s3 + $0xb0] sm:$0xff] }
  0x42   : > { %4288 = vmatmul.mubr.msk.f32.gmra.mrb[16].mxu0 %vm416_vm0, %v377_v32  ;;  %v393_v32 = vcvt.s32.f32 %v357_v27  ;;  %v3742_v27 = vld [vmem:[%s6626_s3 + $0xb8] sm:$0xff] }
  0x43   : > { %4290 = vmatprep.mubr.msk.f32.mxu0 %vm416_vm0, %v378_v35  ;;  %v358_v35 = vand.u32 255, %v322_v31  ;;  %5129 = vmatpush3.bf16.msra.mxu0 %v5725_v33 }
  0x44   : > { %5130 = vmatprep.subr.bf16.mxu0 %v5515_v8 }
  0x45   : > { %v394_v37 = vcvt.s32.f32 %v358_v35  ;;  %v3745_v35 = vld [vmem:[%s6626_s3 + $0xc8] sm:$0xff] }
  0x46   : > { %4291 = vmatmul.mubr.msk.f32.gmra.mrb[18].mxu0 %vm416_vm0, %v379_v39  ;;  %v3796_v39 = vld [vmem:[%s6626_s3 + $0x238] sm:$0xff] }
  0x47   : > { %4293 = vmatprep.mubr.msk.f32.mxu0 %vm416_vm0, %v380_v42  ;;  %v5737_v41 = vpack.c.bf16 %v3796_v39, %v3795_v38  ;;  %v5748_v42 = vld [vmem:[%s6625_s2] ss:$0 sm:$0xff] }
  0x49   : > { %5132 = vmatpush3.bf16.msra.mxu0 %v5737_v41 }
  0x4a   : > { %4294 = vmatmul.mubr.msk.f32.gmra.mrb[20].mxu0 %vm416_vm0, %v381_v45  ;;  %5145 = vmatprep.subr.bf16.mxu0 %v5515_v8 }
  0x4b   : > { %4296 = vmatprep.mubr.msk.f32.mxu0 %vm416_vm0, %v382_v48  ;;  %v5757_v48 = vpack.c.bf16 %v789_v44, %v788_v43  ;;  %v3746_v43 = vld [vmem:[%s6626_s3 + $0xd0] sm:$0xff]  ;;  %v3747_v44 = vld [vmem:[%s6626_s3 + $0xd8] sm:$0xff] }
  0x4e   : > { %4297 = vmatmul.mubr.msk.f32.gmra.mrb[22].mxu0 %vm416_vm0, %v383_v51  ;;  %v791_v51 = vld [vmem:[%s6626_s3 + $0x18] sm:$0xff] }
  0x4f   : > { %4299 = vmatprep.mubr.msk.f32.mxu0 %vm416_vm0, %v384_v54  ;;  %v5769_v54 = vpack.c.bf16 %v791_v51, %v790_v50  ;;  %v3749_v50 = vld [vmem:[%s6626_s3 + $0xe8] sm:$0xff] }
  0x52   : > { %4300 = vmatmul.mubr.msk.f32.gmra.mrb[24].mxu0 %vm416_vm0, %v385_v56  ;;  %v793_v56 = vld [vmem:[%s6626_s3 + $0x28] sm:$0xff] }
  0x53   : > { %4302 = vmatprep.mubr.msk.f32.mxu0 %vm416_vm0, %v386_v58 }
  0x56   : > { %4303 = vmatmul.mubr.msk.f32.gmra.mrb[26].mxu0 %vm416_vm0, %v387_v59  ;;  %v5783_v59 = vpack.c.bf16 %v793_v56, %v792_v55  ;;  %v3750_v56 = vld [vmem:[%s6626_s3 + $0xf0] sm:$0xff] }
  0x57   : > { %4305 = vmatprep.mubr.msk.f32.mxu0 %vm416_vm0, %v388_v5  ;;  %v3736_v5 = vld [vmem:[%s6626_s3 + $0x88] sm:$0xff] }
  0x58   : > { %v5812_v9 = vpack.c.bf16 %v3736_v5, %v3735_v4  ;;  %v3753_v5 = vld [vmem:[%s6626_s3 + $0x100] sm:$0xff] }
  0x5a   : > { %4306 = vmatmul.mubr.msk.f32.gmra.mrb[28].mxu0 %vm416_vm0, %v389_v10 }
  0x5b   : > { %4308 = vmatprep.mubr.msk.f32.mxu0 %vm416_vm0, %v390_v18  ;;  %v5825_v18 = vpack.c.bf16 %v3738_v14, %v3737_v13 }
  0x5e   : > { %4309 = vmatmul.mubr.msk.f32.gmra.mrb[30].mxu0 %vm416_vm0, %v391_v22 }
  0x5f   : > { %4311 = vmatprep.mubr.msk.f32.mxu0 %vm416_vm0, %v392_v28 }
  0x62   : > { %4312 = vmatmul.mubr.msk.f32.gmra.mrb[32].mxu0 %vm416_vm0, %v393_v32  ;;  %v5855_v32 = vpack.c.bf16 %v3742_v27, %v3741_v25 }
  0x63   : > { %4314 = vmatprep.mubr.msk.f32.mxu0 %vm416_vm0, %v394_v37 }
  0x66   : > { %4315 = vmatmul.mubr.msk.f32.gmra.mrb[34].mxu0 %vm416_vm0, %v395_v40  ;;  %v5871_v40 = vpack.c.bf16 %v3745_v35, %v3744_v34 }
  0x67   : > { %4485 = vmatprep.mubr.msk.f32.mxu0 %vm5516_vm2, %v5517_v63 }
  0xf5   : > { %v4265_v45 = vpop.f32.mrb[0].mxu0 }
  0xf6   : > { %v601_v46 = vadd.f32 %v4265_v45, %v5748_v42  ;;  %v595_v47 = vpop.f32.mrb[1].mxu0 }
  0xf7   : > { %v596_v3 = vadd.f32 %v5748_v42, %v595_v47  ;;  %v5890_v47 = vpack.c.bf16 %v3747_v44, %v3746_v43  ;;  %v3763_v43 = vld [vmem:[%s6626_s3 + $0x148] sm:$0xff] }
  0xf8   : > { %v764_v49 = vmax.f32 %v601_v46, 0.0 }
  0xf9   : > { %v5765_v52 = vpop.f32.mrb[2].mxu0  ;;  %v763_v10 = vmax.f32 %v596_v3, 0.0 }
  0xfa   : > { %4334 = vmatmul.mubr.msk.f32.vlgmr.msra.gmra.mrb[0].mxu1 %vm805_vm3, %v764_v49  ;;  %v605_v53 = vpop.f32.mrb[3].mxu0  ;;  %v3748_v49 = vld [vmem:[%s6626_s3 + $0xe0] sm:$0xff] }
  0xfb   : > { %5039 = vmatpush3.bf16.msra.mxu1 %v5757_v48  ;;  %4352 = vmatprep.mubr.msk.f32.mxu1 %vm5516_vm2, %v5517_v63  ;;  %v606_v29 = vadd.f32 %v5748_v42, %v605_v53  ;;  %v5908_v55 = vpack.c.bf16 %v3749_v50, %v3748_v49 }
  0xfc   : > { %5040 = vmatprep.subr.bf16.mxu1 %v5515_v8 }
  0xfd   : > { %v4271_v57 = vpop.f32.mrb[4].mxu0  ;;  %v765_v38 = vmax.f32 %v606_v29, 0.0  ;;  %v5960_v29 = vpack.c.bf16 %v3756_v20, %v3755_v19  ;;  %v3768_v19 = vld [vmem:[%s6626_s3 + $0x170] sm:$0xff]  ;;  %v3769_v20 = vld [vmem:[%s6626_s3 + $0x178] sm:$0xff] }
  0xfe   : > { %v5780_v58 = vpop.f32.mrb[5].mxu0  ;;  %v3751_v57 = vld [vmem:[%s6626_s3 + $0xf8] sm:$0xff] }
  0xff   : > { %5042 = vmatpush3.bf16.msra.mxu1 %v5769_v54  ;;  %v5924_v4 = vpack.c.bf16 %v3751_v57, %v3750_v56  ;;  %v3764_v57 = vld [vmem:[%s6626_s3 + $0x150] sm:$0xff] }
 0x100   : > { %5043 = vmatprep.subr.bf16.mxu1 %v5515_v8 }
 0x101   : > { %v5792_v0 = vpop.f32.mrb[6].mxu0 }
 0x102   : > { %v5794_v1 = vpop.f32.mrb[7].mxu0  ;;  %v630_v50 = vadd.f32 %v5792_v0, %v5748_v42 }
 0x103   : > { %5045 = vmatpush3.bf16.msra.mxu1 %v5783_v59  ;;  %v625_v61 = vadd.f32 %v5748_v42, %v5794_v1 }
 0x104   : > { %5046 = vmatprep.subr.bf16.mxu1 %v5515_v8  ;;  %v769_v0 = vmax.f32 %v630_v50, 0.0  ;;  %v3782_v50 = vld [vmem:[%s6626_s3 + $0x1d0] sm:$0xff] }
 0x105   : > { %v5807_v6 = vpop.f32.mrb[8].mxu0  ;;  %v768_v13 = vmax.f32 %v625_v61, 0.0 }
 0x106   : > { %v5809_v7 = vpop.f32.mrb[9].mxu0 }
 0x107   : > { %5048 = vmatpush3.bf16.msra.mxu1 %v5797_v2  ;;  %v5975_v34 = vadd.f32 %v5748_v42, %v5809_v7  ;;  %v3762_v7 = vld [vmem:[%s6626_s3 + $0x140] sm:$0xff] }
 0x108   : > { %5049 = vmatprep.subr.bf16.mxu1 %v5515_v8  ;;  %v6003_v56 = vpack.c.bf16 %v3763_v43, %v3762_v7  ;;  %v3771_v7 = vld [vmem:[%s6626_s3 + $0x180] sm:$0xff]  ;;  %v3772_v43 = vld [vmem:[%s6626_s3 + $0x188] sm:$0xff] }
 0x109   : > { %v4280_v15 = vpop.f32.mrb[10].mxu0  ;;  %v770_v44 = vmax.f32 %v5975_v34, 0.0  ;;  %v3780_v34 = vld [vmem:[%s6626_s3 + $0x1c0] sm:$0xff] }
 0x10a   : > { %4353 = vmatmul.mubr.msk.f32.vlgmr.msra.gmra.mrb[2].mxu1 %vm805_vm3, %v763_v10  ;;  %v5822_v16 = vpop.f32.mrb[11].mxu0  ;;  %v3754_v10 = vld [vmem:[%s6626_s3 + $0x108] sm:$0xff] }
 0x10b   : > { %5051 = vmatpush3.bf16.msra.mxu1 %v5812_v9  ;;  %4371 = vmatprep.mubr.msk.f32.mxu1 %vm5516_vm2, %v5517_v63  ;;  %v5941_v15 = vpack.c.bf16 %v3754_v10, %v3753_v5  ;;  %v3766_v5 = vld [vmem:[%s6626_s3 + $0x160] sm:$0xff]  ;;  %v3767_v10 = vld [vmem:[%s6626_s3 + $0x168] sm:$0xff] }
 0x10c   : > { %5052 = vmatprep.subr.bf16.mxu1 %v5515_v8 }
 0x10d   : > { %v5836_v21 = vpop.f32.mrb[12].mxu0 }
 0x10e   : > { %v5838_v22 = vpop.f32.mrb[13].mxu0 }
 0x10f   : > { %5054 = vmatpush3.bf16.msra.mxu1 %v5825_v18 }
 0x110   : > { %5055 = vmatprep.subr.bf16.mxu1 %v5515_v8 }
 0x111   : > { %v5850_v28 = vpop.f32.mrb[14].mxu0 }
 0x112   : > { %v663_v30 = vpop.f32.mrb[15].mxu0 }
 0x113   : > { %v664_v31 = vadd.f32 %v5748_v42, %v663_v30  ;;  %5057 = vmatpush3.bf16.msra.mxu1 %v5841_v24  ;;  %v3757_v30 = vld [vmem:[%s6626_s3 + $0x120] sm:$0xff] }
 0x114   : > { %5058 = vmatprep.subr.bf16.mxu1 %v5515_v8 }
 0x115   : > { %v5864_v36 = vmax.f32 %v664_v31, 0.0  ;;  %v4289_v37 = vpop.f32.mrb[16].mxu0  ;;  %v3758_v31 = vld [vmem:[%s6626_s3 + $0x128] sm:$0xff] }
 0x116   : > { %v5866_v39 = vpop.f32.mrb[17].mxu0  ;;  %v5978_v35 = vpack.c.bf16 %v3758_v31, %v3757_v30  ;;  %v3759_v37 = vld [vmem:[%s6626_s3 + $0x130] sm:$0xff]  ;;  %v645_v30 = vadd.f32 %v5748_v42, %v5822_v16  ;;  %v6047_v31 = vpack.c.bf16 %v3769_v20, %v3768_v19  ;;  %v3784_v19 = vld [vmem:[%s6626_s3 + $0x1e0] sm:$0xff]  ;;  %v3785_v20 = vld [vmem:[%s6626_s3 + $0x1e8] sm:$0xff] }
 0x117   : > { %5060 = vmatpush3.bf16.msra.mxu1 %v5855_v32  ;;  %4486 = vmatmul.mubr.msk.f32.vlgmr.msra.gmra.mrb[36].mxu0 %vm805_vm3, %v5864_v36 }
 0x118   : > { %5147 = vmatpush3.bf16.msra.mxu0 %v5757_v48  ;;  %5061 = vmatprep.subr.bf16.mxu1 %v5515_v8 }
 0x119   : > { %5148 = vmatprep.subr.bf16.mxu0 %v5515_v8  ;;  %4523 = vmatprep.mubr.msk.f32.mxu0 %vm5516_vm2, %v5517_v63  ;;  %v5884_v45 = vpop.f32.mrb[18].mxu0 }
 0x11a   : > { %4372 = vmatmul.mubr.msk.f32.vlgmr.msra.gmra.mrb[4].mxu1 %vm805_vm3, %v765_v38  ;;  %v5887_v46 = vpop.f32.mrb[19].mxu0 }
 0x11b   : > { %5063 = vmatpush3.bf16.msra.mxu1 %v5871_v40  ;;  %4390 = vmatprep.mubr.msk.f32.mxu1 %vm5516_vm2, %v5517_v63 }
 0x11c   : > { %5150 = vmatpush3.bf16.msra.mxu0 %v5769_v54  ;;  %5064 = vmatprep.subr.bf16.mxu1 %v5515_v8 }
 0x11d   : > { %5151 = vmatprep.subr.bf16.mxu0 %v5515_v8  ;;  %v5903_v51 = vpop.f32.mrb[20].mxu0 }
 0x11e   : > { %v5905_v53 = vpop.f32.mrb[21].mxu0 }
 0x11f   : > { %5066 = vmatpush3.bf16.msra.mxu1 %v5890_v47 }
 0x120   : > { %5153 = vmatpush3.bf16.msra.mxu0 %v5783_v59  ;;  %5067 = vmatprep.subr.bf16.mxu1 %v5515_v8 }
 0x121   : > { %5154 = vmatprep.subr.bf16.mxu0 %v5515_v8  ;;  %v4298_v60 = vpop.f32.mrb[22].mxu0 }
 0x122   : > { %v5921_v3 = vpop.f32.mrb[23].mxu0  ;;  %v3765_v60 = vld [vmem:[%s6626_s3 + $0x158] sm:$0xff] }
 0x123   : > { %5069 = vmatpush3.bf16.msra.mxu1 %v5908_v55  ;;  %v6016_v61 = vpack.c.bf16 %v3765_v60, %v3764_v57  ;;  %v3783_v57 = vld [vmem:[%s6626_s3 + $0x1d8] sm:$0xff]  ;;  %v6076_v60 = vpack.c.bf16 %v3772_v43, %v3771_v7  ;;  %v6122_v43 = vadd.f32 %v5850_v28, %v5748_v42  ;;  %v6140_v28 = vadd.f32 %v5748_v42, %v5838_v22 }
 0x124   : > { %5156 = vmatpush3.bf16.msra.mxu0 %v5797_v2  ;;  %5070 = vmatprep.subr.bf16.mxu1 %v5515_v8  ;;  %v3787_v7 = vld [vmem:[%s6626_s3 + $0x1f8] sm:$0xff] }
 0x125   : > { %5169 = vmatprep.subr.bf16.mxu0 %v5515_v8  ;;  %v5935_v1 = vpop.f32.mrb[24].mxu0 }
 0x126   : > { %v5937_v14 = vpop.f32.mrb[25].mxu0 }
 0x127   : > { %5072 = vmatpush3.bf16.msra.mxu1 %v5924_v4  ;;  %4524 = vmatmul.mubr.msk.f32.vlgmr.msra.gmra.mrb[38].mxu0 %vm805_vm3, %v765_v38  ;;  %v3760_v38 = vld [vmem:[%s6626_s3 + $0x138] sm:$0xff] }
 0x128   : > { %5171 = vmatpush3.bf16.msra.mxu0 %v5871_v40  ;;  %5073 = vmatprep.subr.bf16.mxu1 %v5515_v8  ;;  %v5997_v49 = vpack.c.bf16 %v3760_v38, %v3759_v37  ;;  %v3781_v37 = vld [vmem:[%s6626_s3 + $0x1c8] sm:$0xff]  ;;  %v772_v38 = vmax.f32 %v645_v30, 0.0 }
 0x129   : > { %5172 = vmatprep.subr.bf16.mxu0 %v5515_v8  ;;  %4561 = vmatprep.mubr.msk.f32.mxu0 %vm5516_vm2, %v5517_v63  ;;  %v5954_v25 = vpop.f32.mrb[26].mxu0  ;;  %v6059_v16 = vpack.c.bf16 %v3781_v37, %v3780_v34  ;;  %v6105_v34 = vpack.c.bf16 %v3785_v20, %v3784_v19  ;;  %v3775_v37 = vld [vmem:[%s6626_s3 + $0x1a0] sm:$0xff]  ;;  %v6631_v19 = vmax.f32 %v6122_v43, 0.0 }
 0x12a   : > { %4391 = vmatmul.mubr.msk.f32.vlgmr.msra.gmra.mrb[6].mxu1 %vm805_vm3, %v768_v13  ;;  %v5957_v27 = vpop.f32.mrb[27].mxu0  ;;  %v6033_v13 = vpack.c.bf16 %v3767_v10, %v3766_v5  ;;  %v3773_v5 = vld [vmem:[%s6626_s3 + $0x190] sm:$0xff]  ;;  %v3774_v10 = vld [vmem:[%s6626_s3 + $0x198] sm:$0xff] }
 0x12b   : > { %5075 = vmatpush3.bf16.msra.mxu1 %v5941_v15  ;;  %4409 = vmatprep.mubr.msk.f32.mxu1 %vm5516_vm2, %v5517_v63  ;;  %v6099_v30 = vpack.c.bf16 %v3774_v10, %v3773_v5  ;;  %v3777_v5 = vld [vmem:[%s6626_s3 + $0x1b0] sm:$0xff]  ;;  %v3778_v10 = vld [vmem:[%s6626_s3 + $0x1b8] sm:$0xff] }
 0x12c   : > { %5174 = vmatpush3.bf16.msra.mxu0 %v5890_v47  ;;  %5076 = vmatprep.subr.bf16.mxu1 %v5515_v8  ;;  %v6144_v20 = vpack.c.bf16 %v3778_v10, %v3777_v5 }
 0x12d   : > { %5175 = vmatprep.subr.bf16.mxu0 %v5515_v8  ;;  %v4307_v22 = vpop.f32.mrb[28].mxu0 }
 0x12f   : > { %5078 = vmatpush3.bf16.msra.mxu1 %v5960_v29 }
 0x130   : > { %5177 = vmatpush3.bf16.msra.mxu0 %v5908_v55  ;;  %5079 = vmatprep.subr.bf16.mxu1 %v5515_v8 }
 0x131   : > { %5178 = vmatprep.subr.bf16.mxu0 %v5515_v8 }
 0x133   : > { %5081 = vmatpush3.bf16.msra.mxu1 %v5978_v35 }
 0x134   : > { %5180 = vmatpush3.bf16.msra.mxu0 %v5924_v4  ;;  %5082 = vmatprep.subr.bf16.mxu1 %v5515_v8 }
 0x135   : > { %5193 = vmatprep.subr.bf16.mxu0 %v5515_v8 }
 0x137   : > { %5084 = vmatpush3.bf16.msra.mxu1 %v5997_v49  ;;  %4562 = vmatmul.mubr.msk.f32.vlgmr.msra.gmra.mrb[40].mxu0 %vm805_vm3, %v770_v44 }
 0x138   : > { %5195 = vmatpush3.bf16.msra.mxu0 %v6003_v56  ;;  %5085 = vmatprep.subr.bf16.mxu1 %v5515_v8 }
 0x139   : > { %5196 = vmatprep.subr.bf16.mxu0 %v5515_v8  ;;  %4599 = vmatprep.mubr.msk.f32.mxu0 %vm5516_vm2, %v5517_v63 }
 0x13a   : > { %4410 = vmatmul.mubr.msk.f32.vlgmr.msra.gmra.mrb[8].mxu1 %vm805_vm3, %v769_v0  ;;  %v6080_v0 = vpack.c.bf16 %v3783_v57, %v3782_v50 }
 0x13b   : > { %5087 = vmatpush3.bf16.msra.mxu1 %v6003_v56  ;;  %4428 = vmatprep.mubr.msk.f32.mxu1 %vm5516_vm2, %v5517_v63 }
 0x13c   : > { %5198 = vmatpush3.bf16.msra.mxu0 %v6016_v61  ;;  %5088 = vmatprep.subr.bf16.mxu1 %v5515_v8 }
 0x13d   : > { %5199 = vmatprep.subr.bf16.mxu0 %v5515_v8 }
 0x13f   : > { %5090 = vmatpush3.bf16.msra.mxu1 %v6016_v61 }
 0x140   : > { %5201 = vmatpush3.bf16.msra.mxu0 %v6033_v13  ;;  %5091 = vmatprep.subr.bf16.mxu1 %v5515_v8 }
 0x141   : > { %5202 = vmatprep.subr.bf16.mxu0 %v5515_v8 }
 0x143   : > { %5093 = vmatpush3.bf16.msra.mxu1 %v6033_v13 }
 0x144   : > { %5204 = vmatpush3.bf16.msra.mxu0 %v6047_v31  ;;  %5094 = vmatprep.subr.bf16.mxu1 %v5515_v8 }
 0x145   : > { %5217 = vmatprep.subr.bf16.mxu0 %v5515_v8 }
 0x147   : > { %5096 = vmatpush3.bf16.msra.mxu1 %v6047_v31  ;;  %4600 = vmatmul.mubr.msk.f32.vlgmr.msra.gmra.mrb[42].mxu0 %vm805_vm3, %v772_v38  ;;  %v3786_v38 = vld [vmem:[%s6626_s3 + $0x1f0] sm:$0xff] }
 0x148   : > { %5219 = vmatpush3.bf16.msra.mxu0 %v6059_v16  ;;  %5097 = vmatprep.subr.bf16.mxu1 %v5515_v8  ;;  %v6129_v57 = vpack.c.bf16 %v3787_v7, %v3786_v38 }
 0x149   : > { %5220 = vmatprep.subr.bf16.mxu0 %v5515_v8  ;;  %4637 = vmatprep.mubr.msk.f32.mxu0 %vm5516_vm2, %v5517_v63 }
 0x14a   : > { %4429 = vmatmul.mubr.msk.f32.vlgmr.msra.gmra.mrb[10].mxu1 %vm805_vm3, %v770_v44  ;;  %v3776_v44 = vld [vmem:[%s6626_s3 + $0x1a8] sm:$0xff] }
 0x14b   : > { %5099 = vmatpush3.bf16.msra.mxu1 %v6076_v60  ;;  %4447 = vmatprep.mubr.msk.f32.mxu1 %vm5516_vm2, %v5517_v63  ;;  %v6125_v50 = vpack.c.bf16 %v3776_v44, %v3775_v37  ;;  %v773_v37 = vmax.f32 %v6140_v28, 0.0  ;;  %v659_v44 = vadd.f32 %v5836_v21, %v5748_v42  ;;  %v6193_v21 = vpop.f32.mrb[29].mxu0 }
 0x14c   : > { %5222 = vmatpush3.bf16.msra.mxu0 %v6080_v0  ;;  %5100 = vmatprep.subr.bf16.mxu1 %v5515_v8  ;;  %v4310_v7 = vpop.f32.mrb[30].mxu0 }
 0x14d   : > { %5223 = vmatprep.subr.bf16.mxu0 %v5515_v8  ;;  %v774_v38 = vmax.f32 %v659_v44, 0.0  ;;  %v740_v5 = vpop.f32.mrb[31].mxu0  ;;  %v611_v44 = vadd.f32 %v5765_v52, %v5748_v42  ;;  %v688_v52 = vadd.f32 %v5884_v45, %v5748_v42 }
 0x14e   : > { %v4313_v10 = vpop.f32.mrb[32].mxu0  ;;  %v616_v5 = vadd.f32 %v5748_v42, %v5780_v58  ;;  %v712_v58 = vadd.f32 %v5748_v42, %v5937_v14 }
 0x14f   : > { %5102 = vmatpush3.bf16.msra.mxu1 %v6099_v30  ;;  %v748_v22 = vpop.f32.mrb[33].mxu0  ;;  %v766_v7 = vmax.f32 %v611_v44, 0.0 }
 0x150   : > { %5225 = vmatpush3.bf16.msra.mxu0 %v6105_v34  ;;  %5103 = vmatprep.subr.bf16.mxu1 %v5515_v8  ;;  %v767_v45 = vmax.f32 %v616_v5, 0.0  ;;  %v783_v10 = vmax.f32 %v712_v58, 0.0  ;;  %v640_v22 = vadd.f32 %v5807_v6, %v5748_v42  ;;  %v6274_v6 = vadd.f32 %v5748_v42, %v5957_v27 }
 0x151   : > { %5226 = vmatprep.subr.bf16.mxu0 %v5515_v8  ;;  %v6307_v27 = vadd.f32 %v5748_v42, %v5866_v39  ;;  %v683_v39 = vadd.f32 %v5748_v42, %v5887_v46 }
 0x152   : > { %v771_v14 = vmax.f32 %v640_v22, 0.0  ;;  %v785_v44 = vmax.f32 %v6274_v6, 0.0 }
 0x153   : > { %5105 = vmatpush3.bf16.msra.mxu1 %v6125_v50 }
 0x154   : > { %5228 = vmatpush3.bf16.msra.mxu0 %v6129_v57  ;;  %5106 = vmatprep.subr.bf16.mxu1 %v5515_v8 }
 0x155   : > { %5241 = vmatprep.subr.bf16.mxu0 %v5515_v8 }
 0x157   : > { %5108 = vmatpush3.bf16.msra.mxu1 %v6144_v20  ;;  %4638 = vmatmul.mubr.msk.f32.vlgmr.msra.gmra.mrb[44].mxu0 %vm805_vm3, %v6631_v19 }
 0x158   : > { %5243 = vmatpush3.bf16.msra.mxu0 %v5595_v12  ;;  %5109 = vmatprep.subr.bf16.mxu1 %v5515_v8 }
 0x159   : > { %5244 = vmatprep.subr.bf16.mxu0 %v5515_v8  ;;  %4675 = vmatprep.mubr.msk.f32.mxu0 %vm5516_vm2, %v5517_v63 }
 0x15a   : > { %4448 = vmatmul.mubr.msk.f32.vlgmr.msra.gmra.mrb[12].mxu1 %vm805_vm3, %v773_v37 }
 0x15b   : > { %5111 = vmatpush3.bf16.msra.mxu1 %v6059_v16  ;;  %4466 = vmatprep.mubr.msk.f32.mxu1 %vm5516_vm2, %v5517_v63 }
 0x15c   : > { %5246 = vmatpush3.bf16.msra.mxu0 %v5615_v17  ;;  %5112 = vmatprep.subr.bf16.mxu1 %v5515_v8 }
 0x15d   : > { %5247 = vmatprep.subr.bf16.mxu0 %v5515_v8 }
 0x15f   : > { %5114 = vmatpush3.bf16.msra.mxu1 %v6080_v0 }
 0x160   : > { %5249 = vmatpush3.bf16.msra.mxu0 %v5632_v26  ;;  %5115 = vmatprep.subr.bf16.mxu1 %v5515_v8 }
 0x161   : > { %5250 = vmatprep.subr.bf16.mxu0 %v5515_v8 }
 0x163   : > { %5117 = vmatpush3.bf16.msra.mxu1 %v6105_v34 }
 0x164   : > { %5252 = vmatpush3.bf16.msra.mxu0 %v5687_v62  ;;  %5118 = vmatprep.subr.bf16.mxu1 %v5515_v8 }
 0x165   : > { %5265 = vmatprep.subr.bf16.mxu0 %v5515_v8 }
 0x167   : > { %5120 = vmatpush3.bf16.msra.mxu1 %v6129_v57  ;;  %4676 = vmatmul.mubr.msk.f32.vlgmr.msra.gmra.mrb[46].mxu0 %vm805_vm3, %v774_v38 }
 0x168   : > { %5267 = vmatpush3.bf16.msra.mxu0 %v5812_v9  ;;  %5133 = vmatprep.subr.bf16.mxu1 %v5515_v8 }
 0x169   : > { %5268 = vmatprep.subr.bf16.mxu0 %v5515_v8  ;;  %4713 = vmatprep.mubr.msk.f32.mxu0 %vm5516_vm2, %v5517_v63 }
 0x16a   : > { %4467 = vmatmul.mubr.msk.f32.vlgmr.msra.gmra.mrb[14].mxu1 %vm805_vm3, %v774_v38  ;;  %v4316_v38 = vpop.f32.mrb[34].mxu0 }
 0x16b   : > { %5135 = vmatpush3.bf16.msra.mxu1 %v5595_v12  ;;  %4504 = vmatprep.mubr.msk.f32.mxu1 %vm5516_vm2, %v5517_v63  ;;  %v756_v19 = vpop.f32.mrb[35].mxu0  ;;  %v777_v38 = vmax.f32 %v6307_v27, 0.0 }
 0x16c   : > { %5270 = vmatpush3.bf16.msra.mxu0 %v5825_v18  ;;  %5136 = vmatprep.subr.bf16.mxu1 %v5515_v8  ;;  %v779_v19 = vmax.f32 %v688_v52, 0.0 }
 0x16d   : > { %5271 = vmatprep.subr.bf16.mxu0 %v5515_v8 }
 0x16f   : > { %5138 = vmatpush3.bf16.msra.mxu1 %v5615_v17 }
 0x170   : > { %5273 = vmatpush3.bf16.msra.mxu0 %v5841_v24  ;;  %5139 = vmatprep.subr.bf16.mxu1 %v5515_v8 }
 0x171   : > { %5274 = vmatprep.subr.bf16.mxu0 %v5515_v8 }
 0x173   : > { %5141 = vmatpush3.bf16.msra.mxu1 %v5632_v26 }
 0x174   : > { %5276 = vmatpush3.bf16.msra.mxu0 %v5855_v32  ;;  %5142 = vmatprep.subr.bf16.mxu1 %v5515_v8 }
 0x175   : > { %5289 = vmatprep.subr.bf16.mxu0 %v5515_v8 }
 0x177   : > { %5144 = vmatpush3.bf16.msra.mxu1 %v5687_v62  ;;  %4714 = vmatmul.mubr.msk.f32.vlgmr.msra.gmra.mrb[48].mxu0 %vm805_vm3, %v5864_v36 }
 0x178   : > { %5291 = vmatpush3.bf16.msra.mxu0 %v5941_v15  ;;  %5157 = vmatprep.subr.bf16.mxu1 %v5515_v8 }
 0x179   : > { %5292 = vmatprep.subr.bf16.mxu0 %v5515_v8  ;;  %4751 = vmatprep.mubr.msk.f32.mxu0 %vm5516_vm2, %v5517_v63 }
 0x17a   : > { %4505 = vmatmul.mubr.msk.f32.vlgmr.msra.gmra.mrb[16].mxu1 %vm805_vm3, %v766_v7 }
 0x17b   : > { %5159 = vmatpush3.bf16.msra.mxu1 %v5812_v9  ;;  %4542 = vmatprep.mubr.msk.f32.mxu1 %vm5516_vm2, %v5517_v63 }
 0x17c   : > { %5294 = vmatpush3.bf16.msra.mxu0 %v5960_v29  ;;  %5160 = vmatprep.subr.bf16.mxu1 %v5515_v8 }
 0x17d   : > { %5295 = vmatprep.subr.bf16.mxu0 %v5515_v8 }
 0x17f   : > { %5162 = vmatpush3.bf16.msra.mxu1 %v5825_v18 }
 0x180   : > { %5297 = vmatpush3.bf16.msra.mxu0 %v5978_v35  ;;  %5163 = vmatprep.subr.bf16.mxu1 %v5515_v8 }
 0x181   : > { %5298 = vmatprep.subr.bf16.mxu0 %v5515_v8 }
 0x183   : > { %5165 = vmatpush3.bf16.msra.mxu1 %v5841_v24 }
 0x184   : > { %5300 = vmatpush3.bf16.msra.mxu0 %v5997_v49  ;;  %5166 = vmatprep.subr.bf16.mxu1 %v5515_v8 }
 0x185   : > { %5313 = vmatprep.subr.bf16.mxu0 %v5515_v8 }
 0x187   : > { %5168 = vmatpush3.bf16.msra.mxu1 %v5855_v32  ;;  %4752 = vmatmul.mubr.msk.f32.vlgmr.msra.gmra.mrb[50].mxu0 %vm805_vm3, %v779_v19 }
 0x188   : > { %5315 = vmatpush3.bf16.msra.mxu0 %v6076_v60  ;;  %5181 = vmatprep.subr.bf16.mxu1 %v5515_v8 }
 0x189   : > { %5316 = vmatprep.subr.bf16.mxu0 %v5515_v8  ;;  %4789 = vmatprep.mubr.msk.f32.mxu0 %vm5516_vm2, %v5517_v63 }
 0x18a   : > { %4543 = vmatmul.mubr.msk.f32.vlgmr.msra.gmra.mrb[18].mxu1 %vm805_vm3, %v767_v45 }
 0x18b   : > { %5183 = vmatpush3.bf16.msra.mxu1 %v5941_v15  ;;  %4580 = vmatprep.mubr.msk.f32.mxu1 %vm5516_vm2, %v5517_v63 }
 0x18c   : > { %5318 = vmatpush3.bf16.msra.mxu0 %v6099_v30  ;;  %5184 = vmatprep.subr.bf16.mxu1 %v5515_v8 }
 0x18d   : > { %5319 = vmatprep.subr.bf16.mxu0 %v5515_v8 }
 0x18f   : > { %5186 = vmatpush3.bf16.msra.mxu1 %v5960_v29 }
 0x190   : > { %5321 = vmatpush3.bf16.msra.mxu0 %v6125_v50  ;;  %5187 = vmatprep.subr.bf16.mxu1 %v5515_v8 }
 0x191   : > { %5322 = vmatprep.subr.bf16.mxu0 %v5515_v8 }
 0x193   : > { %5189 = vmatpush3.bf16.msra.mxu1 %v5978_v35 }
 0x194   : > { %5324 = vmatpush3.bf16.msra.mxu0 %v6144_v20  ;;  %5190 = vmatprep.subr.bf16.mxu1 %v5515_v8 }
 0x195   : > { %5337 = vmatprep.subr.bf16.mxu0 %v5515_v8 }
 0x197   : > { %5192 = vmatpush3.bf16.msra.mxu1 %v5997_v49  ;;  %4790 = vmatmul.mubr.msk.f32.vlgmr.msra.gmra.mrb[52].mxu0 %vm805_vm3, %v783_v10 }
 0x198   : > { %5339 = vmatpush3.bf16.msra.mxu0 %v5700_v11  ;;  %5205 = vmatprep.subr.bf16.mxu1 %v5515_v8 }
 0x199   : > { %5340 = vmatprep.subr.bf16.mxu0 %v5515_v8  ;;  %4827 = vmatprep.mubr.msk.f32.mxu0 %vm5516_vm2, %v5517_v63 }
 0x19a   : > { %4581 = vmatmul.mubr.msk.f32.vlgmr.msra.gmra.mrb[20].mxu1 %vm805_vm3, %v771_v14 }
 0x19b   : > { %5207 = vmatpush3.bf16.msra.mxu1 %v6076_v60  ;;  %4618 = vmatprep.mubr.msk.f32.mxu1 %vm5516_vm2, %v5517_v63 }
 0x19c   : > { %5342 = vmatpush3.bf16.msra.mxu0 %v5713_v23  ;;  %5208 = vmatprep.subr.bf16.mxu1 %v5515_v8 }
 0x19d   : > { %5343 = vmatprep.subr.bf16.mxu0 %v5515_v8 }
 0x19f   : > { %5210 = vmatpush3.bf16.msra.mxu1 %v6099_v30 }
 0x1a0   : > { %5345 = vmatpush3.bf16.msra.mxu0 %v5725_v33  ;;  %5211 = vmatprep.subr.bf16.mxu1 %v5515_v8 }
 0x1a1   : > { %5346 = vmatprep.subr.bf16.mxu0 %v5515_v8 }
 0x1a3   : > { %5213 = vmatpush3.bf16.msra.mxu1 %v6125_v50 }
 0x1a4   : > { %5348 = vmatpush3.bf16.msra.mxu0 %v5737_v41  ;;  %5214 = vmatprep.subr.bf16.mxu1 %v5515_v8 }
 0x1a5   : > { %5361 = vmatprep.subr.bf16.mxu0 %v5515_v8 }
 0x1a7   : > { %5216 = vmatpush3.bf16.msra.mxu1 %v6144_v20  ;;  %4828 = vmatmul.mubr.msk.f32.vlgmr.msra.gmra.mrb[54].mxu0 %vm805_vm3, %v785_v44 }
 0x1a8   : > { %5363 = vmatpush3.bf16.msra.mxu0 %v5757_v48  ;;  %5229 = vmatprep.subr.bf16.mxu1 %v5515_v8 }
 0x1a9   : > { %5364 = vmatprep.subr.bf16.mxu0 %v5515_v8  ;;  %4865 = vmatprep.mubr.msk.f32.mxu0 %vm5516_vm2, %v5517_v63 }
 0x1aa   : > { %4619 = vmatmul.mubr.msk.f32.vlgmr.msra.gmra.mrb[22].mxu1 %vm805_vm3, %v5864_v36 }
 0x1ab   : > { %5231 = vmatpush3.bf16.msra.mxu1 %v5700_v11  ;;  %4656 = vmatprep.mubr.msk.f32.mxu1 %vm5516_vm2, %v5517_v63 }
 0x1ac   : > { %5366 = vmatpush3.bf16.msra.mxu0 %v5769_v54  ;;  %5232 = vmatprep.subr.bf16.mxu1 %v5515_v8 }
 0x1ad   : > { %5367 = vmatprep.subr.bf16.mxu0 %v5515_v8 }
 0x1af   : > { %5234 = vmatpush3.bf16.msra.mxu1 %v5713_v23 }
 0x1b0   : > { %5369 = vmatpush3.bf16.msra.mxu0 %v5783_v59  ;;  %5235 = vmatprep.subr.bf16.mxu1 %v5515_v8 }
 0x1b1   : > { %5370 = vmatprep.subr.bf16.mxu0 %v5515_v8 }
 0x1b3   : > { %5237 = vmatpush3.bf16.msra.mxu1 %v5725_v33 }
 0x1b4   : > { %5372 = vmatpush3.bf16.msra.mxu0 %v5797_v2  ;;  %5238 = vmatprep.subr.bf16.mxu1 %v5515_v8 }
 0x1b5   : > { %5385 = vmatprep.subr.bf16.mxu0 %v5515_v8 }
 0x1b7   : > { %5240 = vmatpush3.bf16.msra.mxu1 %v5737_v41  ;;  %4866 = vmatmul.mubr.msk.f32.vlgmr.msra.gmra.mrb[56].mxu0 %vm805_vm3, %v5864_v36  ;;  %v6333_v36 = vadd.f32 %v5748_v42, %v5905_v53  ;;  %v778_v53 = vmax.f32 %v683_v39, 0.0 }
 0x1b8   : > { %5253 = vmatprep.subr.bf16.mxu1 %v5515_v8  ;;  %5387 = vmatpush3.bf16.msra.mxu0 %v5871_v40 }
 0x1b9   : > { %5388 = vmatprep.subr.bf16.mxu0 %v5515_v8  ;;  %4903 = vmatprep.mubr.msk.f32.mxu0 %vm5516_vm2, %v5517_v63 }
 0x1ba   : > { %4657 = vmatmul.mubr.msk.f32.vlgmr.msra.gmra.mrb[24].mxu1 %vm805_vm3, %v777_v38 }
 0x1bb   : > { %5255 = vmatpush3.bf16.msra.mxu1 %v5757_v48  ;;  %4694 = vmatprep.mubr.msk.f32.mxu1 %vm5516_vm2, %v5517_v63  ;;  %v780_v48 = vmax.f32 %v6333_v36, 0.0 }
 0x1bc   : > { %5256 = vmatprep.subr.bf16.mxu1 %v5515_v8  ;;  %5390 = vmatpush3.bf16.msra.mxu0 %v5890_v47 }
 0x1bd   : > { %5391 = vmatprep.subr.bf16.mxu0 %v5515_v8 }
 0x1bf   : > { %5258 = vmatpush3.bf16.msra.mxu1 %v5769_v54 }
 0x1c0   : > { %5259 = vmatprep.subr.bf16.mxu1 %v5515_v8  ;;  %5393 = vmatpush3.bf16.msra.mxu0 %v5908_v55 }
 0x1c1   : > { %5394 = vmatprep.subr.bf16.mxu0 %v5515_v8 }
 0x1c3   : > { %5261 = vmatpush3.bf16.msra.mxu1 %v5783_v59 }
 0x1c4   : > { %5262 = vmatprep.subr.bf16.mxu1 %v5515_v8  ;;  %5396 = vmatpush3.bf16.msra.mxu0 %v5924_v4 }
 0x1c5   : > { %5409 = vmatprep.subr.bf16.mxu0 %v5515_v8 }
 0x1c7   : > { %5264 = vmatpush3.bf16.msra.mxu1 %v5797_v2  ;;  %4904 = vmatmul.mubr.msk.f32.vlgmr.msra.gmra.mrb[58].mxu0 %vm805_vm3, %v780_v48  ;;  %v703_v2 = vadd.f32 %v5748_v42, %v5921_v3  ;;  %v727_v3 = vadd.f32 %v5954_v25, %v5748_v42 }
 0x1c8   : > { %5277 = vmatprep.subr.bf16.mxu1 %v5515_v8  ;;  %5411 = vmatpush3.bf16.msra.mxu0 %v6003_v56 }
 0x1c9   : > { %5412 = vmatprep.subr.bf16.mxu0 %v5515_v8  ;;  %4941 = vmatprep.mubr.msk.f32.mxu0 %vm5516_vm2, %v5517_v63 }
 0x1ca   : > { %4695 = vmatmul.mubr.msk.f32.vlgmr.msra.gmra.mrb[26].mxu1 %vm805_vm3, %v773_v37 }
 0x1cb   : > { %5279 = vmatpush3.bf16.msra.mxu1 %v5871_v40  ;;  %4732 = vmatprep.mubr.msk.f32.mxu1 %vm5516_vm2, %v5517_v63  ;;  %v782_v40 = vmax.f32 %v703_v2, 0.0 }
 0x1cc   : > { %5280 = vmatprep.subr.bf16.mxu1 %v5515_v8  ;;  %5414 = vmatpush3.bf16.msra.mxu0 %v6016_v61 }
 0x1cd   : > { %v875_v54 = vpop.f32.mrb[0].mxu1  ;;  %5415 = vmatprep.subr.bf16.mxu0 %v5515_v8 }
 0x1ce   : > { %v4335_v59 = vpop.f32.mrb[1].mxu1 }
 0x1cf   : > { %5282 = vmatpush3.bf16.msra.mxu1 %v5890_v47 }
 0x1d0   : > { %5283 = vmatprep.subr.bf16.mxu1 %v5515_v8  ;;  %5417 = vmatpush3.bf16.msra.mxu0 %v6033_v13 }
 0x1d1   : > { %5418 = vmatprep.subr.bf16.mxu0 %v5515_v8 }
 0x1d3   : > { %5285 = vmatpush3.bf16.msra.mxu1 %v5908_v55 }
 0x1d4   : > { %5286 = vmatprep.subr.bf16.mxu1 %v5515_v8  ;;  %5420 = vmatpush3.bf16.msra.mxu0 %v6047_v31 }
 0x1d5   : > { %5433 = vmatprep.subr.bf16.mxu0 %v5515_v8 }
 0x1d7   : > { %5288 = vmatpush3.bf16.msra.mxu1 %v5924_v4  ;;  %4942 = vmatmul.mubr.msk.f32.vlgmr.msra.gmra.mrb[60].mxu0 %vm805_vm3, %v782_v40  ;;  %v786_v4 = vmax.f32 %v727_v3, 0.0 }
 0x1d8   : > { %5301 = vmatprep.subr.bf16.mxu1 %v5515_v8  ;;  %5435 = vmatpush3.bf16.msra.mxu0 %v6059_v16 }
 0x1d9   : > { %5436 = vmatprep.subr.bf16.mxu0 %v5515_v8  ;;  %4979 = vmatprep.mubr.msk.f32.mxu0 %vm5516_vm2, %v5517_v63 }
 0x1da   : > { %4733 = vmatmul.mubr.msk.f32.vlgmr.msra.gmra.mrb[28].mxu1 %vm805_vm3, %v778_v53 }
 0x1db   : > { %5303 = vmatpush3.bf16.msra.mxu1 %v6003_v56  ;;  %4770 = vmatprep.mubr.msk.f32.mxu1 %vm5516_vm2, %v5517_v63 }
 0x1dc   : > { %5304 = vmatprep.subr.bf16.mxu1 %v5515_v8  ;;  %5438 = vmatpush3.bf16.msra.mxu0 %v6080_v0 }
 0x1dd   : > { %v948_v46 = vpop.f32.mrb[2].mxu1  ;;  %5439 = vmatprep.subr.bf16.mxu0 %v5515_v8 }
 0x1de   : > { %v949_v47 = vadd.f32 %v948_v46, %v875_v54  ;;  %v4354_v55 = vpop.f32.mrb[3].mxu1 }
 0x1df   : > { %5306 = vmatpush3.bf16.msra.mxu1 %v6016_v61 }
 0x1e0   : > { %5307 = vmatprep.subr.bf16.mxu1 %v5515_v8  ;;  %5441 = vmatpush3.bf16.msra.mxu0 %v6105_v34 }
 0x1e1   : > { %5442 = vmatprep.subr.bf16.mxu0 %v5515_v8 }
 0x1e3   : > { %5309 = vmatpush3.bf16.msra.mxu1 %v6033_v13 }
 0x1e4   : > { %5310 = vmatprep.subr.bf16.mxu1 %v5515_v8  ;;  %5444 = vmatpush3.bf16.msra.mxu0 %v6129_v57 }
 0x1e7   : > { %5312 = vmatpush3.bf16.msra.mxu1 %v6047_v31  ;;  %4980 = vmatmul.mubr.msk.f32.vlgmr.msra.gmra.mrb[62].mxu0 %vm805_vm3, %v786_v4  ;;  %v717_v31 = vadd.f32 %v5935_v1, %v5748_v42 }
 0x1e8   : > { %5325 = vmatprep.subr.bf16.mxu1 %v5515_v8 }
 0x1ea   : > { %4771 = vmatmul.mubr.msk.f32.vlgmr.msra.gmra.mrb[30].mxu1 %vm805_vm3, %v780_v48  ;;  %v6399_v25 = vpop.f32.mrb[36].mxu0 }
 0x1eb   : > { %5327 = vmatpush3.bf16.msra.mxu1 %v6059_v16  ;;  %v4487_v56 = vpop.f32.mrb[37].mxu0  ;;  %4808 = vmatprep.mubr.msk.f32.mxu1 %vm5516_vm2, %v5517_v63  ;;  %v784_v16 = vmax.f32 %v717_v31, 0.0 }
 0x1ec   : > { %5328 = vmatprep.subr.bf16.mxu1 %v5515_v8 }
 0x1ed   : > { %v1030_v61 = vpop.f32.mrb[4].mxu1 }
 0x1ee   : > { %v1034_v13 = vadd.f32 %v1030_v61, %v949_v47  ;;  %v4373_v28 = vpop.f32.mrb[5].mxu1 }
 0x1ef   : > { %5330 = vmatpush3.bf16.msra.mxu1 %v6080_v0 }
 0x1f0   : > { %5331 = vmatprep.subr.bf16.mxu1 %v5515_v8 }
 0x1f3   : > { %5333 = vmatpush3.bf16.msra.mxu1 %v6105_v34 }
 0x1f4   : > { %5334 = vmatprep.subr.bf16.mxu1 %v5515_v8 }
 0x1f7   : > { %5336 = vmatpush3.bf16.msra.mxu1 %v6129_v57 }
 0x1f8   : > { %5349 = vmatprep.subr.bf16.mxu1 %v5515_v8 }
 0x1fa   : > { %v6413_v37 = vpop.f32.mrb[38].mxu0  ;;  %4809 = vmatmul.mubr.msk.f32.vlgmr.msra.gmra.mrb[32].mxu1 %vm805_vm3, %v784_v16 }
 0x1fb   : > { %v4525_v7 = vpop.f32.mrb[39].mxu0  ;;  %5351 = vmatpush3.bf16.msra.mxu1 %v5595_v12  ;;  %4846 = vmatprep.mubr.msk.f32.mxu1 %vm5516_vm2, %v5517_v63  ;;  %v6632_v12 = vmax.f32 %v6122_v43, 0.0 }
 0x1fc   : > { %5352 = vmatprep.subr.bf16.mxu1 %v5515_v8 }
 0x1fd   : > { %v1113_v1 = vpop.f32.mrb[6].mxu1 }
 0x1fe   : > { %v1117_v0 = vadd.f32 %v1113_v1, %v1034_v13  ;;  %v4392_v34 = vpop.f32.mrb[7].mxu1  ;;  %v3533_v1 = vld [vmem:[%s6628_s5 + $0x80] sm:$0xff] }
 0x1ff   : > { %5354 = vmatpush3.bf16.msra.mxu1 %v5615_v17  ;;  %v3517_v34 = vld [vmem:[%s6628_s5] sm:$0xff] }
 0x200   : > { %5355 = vmatprep.subr.bf16.mxu1 %v5515_v8 }
 0x203   : > { %5357 = vmatpush3.bf16.msra.mxu1 %v5632_v26 }
 0x204   : > { %5358 = vmatprep.subr.bf16.mxu1 %v5515_v8 }
 0x207   : > { %5360 = vmatpush3.bf16.msra.mxu1 %v5687_v62 }
 0x208   : > { %5373 = vmatprep.subr.bf16.mxu1 %v5515_v8 }
 0x20a   : > { %4847 = vmatmul.mubr.msk.f32.vlgmr.msra.gmra.mrb[34].mxu1 %vm805_vm3, %v6632_v12  ;;  %v6429_v57 = vpop.f32.mrb[40].mxu0 }
 0x20b   : > { %5375 = vmatpush3.bf16.msra.mxu1 %v5812_v9  ;;  %4884 = vmatprep.mubr.msk.f32.mxu1 %vm5516_vm2, %v5517_v63  ;;  %v4563_v17 = vpop.f32.mrb[41].mxu0 }
 0x20c   : > { %5376 = vmatprep.subr.bf16.mxu1 %v5515_v8  ;;  %v3535_v17 = vld [vmem:[%s6628_s5 + $0x90] sm:$0xff] }
 0x20d   : > { %v1196_v26 = vpop.f32.mrb[8].mxu1 }
 0x20e   : > { %v1200_v52 = vadd.f32 %v1196_v26, %v1117_v0  ;;  %v4411_v19 = vpop.f32.mrb[9].mxu1  ;;  %v3534_v0 = vld [vmem:[%s6628_s5 + $0x88] sm:$0xff]  ;;  %v3536_v26 = vld [vmem:[%s6628_s5 + $0x98] sm:$0xff] }
 0x20f   : > { %5378 = vmatpush3.bf16.msra.mxu1 %v5825_v18  ;;  %v5457_v12 = vpack.c.bf16 %v3534_v0, %v3533_v1  ;;  %v5461_v19 = vpack.c.bf16 %v3536_v26, %v3535_v17 }
 0x210   : > { %5379 = vmatprep.subr.bf16.mxu1 %v5515_v8 }
 0x211   : > { %5458 = vmatprep.subr.bf16.mxu0 %v5457_v12 }
 0x213   : > { %5381 = vmatpush3.bf16.msra.mxu1 %v5841_v24 }
 0x214   : > { %5382 = vmatprep.subr.bf16.mxu1 %v5515_v8 }
 0x217   : > { %5384 = vmatpush3.bf16.msra.mxu1 %v5855_v32  ;;  %v698_v32 = vadd.f32 %v5903_v51, %v5748_v42 }
 0x218   : > { %5397 = vmatprep.subr.bf16.mxu1 %v5515_v8 }
 0x21a   : > { %4885 = vmatmul.mubr.msk.f32.vlgmr.msra.gmra.mrb[36].mxu1 %vm805_vm3, %v777_v38  ;;  %v6444_v62 = vpop.f32.mrb[42].mxu0 }
 0x21b   : > { %5399 = vmatpush3.bf16.msra.mxu1 %v5941_v15  ;;  %v4601_v9 = vpop.f32.mrb[43].mxu0  ;;  %4922 = vmatprep.mubr.msk.f32.mxu1 %vm5516_vm2, %v5517_v63  ;;  %v781_v15 = vmax.f32 %v698_v32, 0.0 }
 0x21c   : > { %5400 = vmatprep.subr.bf16.mxu1 %v5515_v8  ;;  %v3520_v9 = vld [vmem:[%s6628_s5 + $0x18] sm:$0xff] }
 0x21d   : > { %v1279_v18 = vpop.f32.mrb[10].mxu1 }
 0x21e   : > { %v1283_v24 = vadd.f32 %v1279_v18, %v1200_v52  ;;  %v4430_v43 = vpop.f32.mrb[11].mxu1  ;;  %v3537_v18 = vld [vmem:[%s6628_s5 + $0xa0] sm:$0xff] }
 0x21f   : > { %5402 = vmatpush3.bf16.msra.mxu1 %v5960_v29 }
 0x220   : > { %5403 = vmatprep.subr.bf16.mxu1 %v5515_v8 }
 0x223   : > { %5405 = vmatpush3.bf16.msra.mxu1 %v5978_v35 }
 0x224   : > { %5406 = vmatprep.subr.bf16.mxu1 %v5515_v8 }
 0x227   : > { %5408 = vmatpush3.bf16.msra.mxu1 %v5997_v49 }
 0x228   : > { %5421 = vmatprep.subr.bf16.mxu1 %v5515_v8 }
 0x22a   : > { %4923 = vmatmul.mubr.msk.f32.vlgmr.msra.gmra.mrb[38].mxu1 %vm805_vm3, %v781_v15  ;;  %v2118_v5 = vpop.f32.mrb[44].mxu0 }
 0x22b   : > { %5423 = vmatpush3.bf16.msra.mxu1 %v6076_v60  ;;  %v4639_v29 = vpop.f32.mrb[45].mxu0  ;;  %4960 = vmatprep.mubr.msk.f32.mxu1 %vm5516_vm2, %v5517_v63 }
 0x22c   : > { %5424 = vmatprep.subr.bf16.mxu1 %v5515_v8  ;;  %v3521_v29 = vld [vmem:[%s6628_s5 + $0x20] sm:$0xff] }
 0x22d   : > { %v1362_v35 = vpop.f32.mrb[12].mxu1 }
 0x22e   : > { %v1366_v42 = vadd.f32 %v1362_v35, %v1283_v24  ;;  %v4449_v51 = vpop.f32.mrb[13].mxu1  ;;  %v3538_v24 = vld [vmem:[%s6628_s5 + $0xa8] sm:$0xff] }
 0x22f   : > { %5426 = vmatpush3.bf16.msra.mxu1 %v6099_v30  ;;  %v3522_v35 = vld [vmem:[%s6628_s5 + $0x28] sm:$0xff]  ;;  %v3540_v51 = vld [vmem:[%s6628_s5 + $0xb8] sm:$0xff] }
 0x230   : > { %5427 = vmatprep.subr.bf16.mxu1 %v5515_v8 }
 0x233   : > { %5429 = vmatpush3.bf16.msra.mxu1 %v6125_v50 }
 0x234   : > { %5430 = vmatprep.subr.bf16.mxu1 %v5515_v8 }
 0x237   : > { %5432 = vmatpush3.bf16.msra.mxu1 %v6144_v20 }
 0x238   : > { %5445 = vmatprep.subr.bf16.mxu1 %v5515_v8 }
 0x23a   : > { %v2265_v49 = vpop.f32.mrb[46].mxu0  ;;  %4961 = vmatmul.mubr.msk.f32.vlgmr.msra.gmra.mrb[40].mxu1 %vm805_vm3, %v785_v44 }
 0x23b   : > { %v4677_v60 = vpop.f32.mrb[47].mxu0  ;;  %5447 = vmatpush3.bf16.msra.mxu1 %v5700_v11  ;;  %4998 = vmatprep.mubr.msk.f32.mxu1 %vm5516_vm2, %v5517_v63  ;;  %v5506_v11 = vld [vmem:[%s6625_s2] ss:$0 sm:$0xff] }
 0x23c   : > { %5448 = vmatprep.subr.bf16.mxu1 %v5515_v8  ;;  %v732_v63 = vadd.f32 %v5506_v11, %v6193_v21  ;;  %v3523_v11 = vld [vmem:[%s6628_s5 + $0x30] sm:$0xff] }
 0x23d   : > { %v1445_v30 = vpop.f32.mrb[14].mxu1 }
 0x23e   : > { %v1449_v50 = vadd.f32 %v1445_v30, %v1366_v42  ;;  %v4468_v45 = vpop.f32.mrb[15].mxu1  ;;  %v787_v58 = vmax.f32 %v732_v63, 0.0  ;;  %v3539_v42 = vld [vmem:[%s6628_s5 + $0xb0] sm:$0xff]  ;;  %v3524_v63 = vld [vmem:[%s6628_s5 + $0x38] sm:$0xff] }
 0x23f   : > { %5450 = vmatpush3.bf16.msra.mxu1 %v5713_v23  ;;  %v5469_v45 = vpack.c.bf16 %v3540_v51, %v3539_v42 }
 0x240   : > { %v6478_v20 = vadd.f32 %v6399_v25, %v1449_v50  ;;  %5451 = vmatprep.subr.bf16.mxu1 %v5515_v8  ;;  %v5467_v50 = vpack.c.bf16 %v3522_v35, %v3521_v29  ;;  %v3798_v29 = vld [vmem:[%s6627_s4] ss:$0 sm:$0xff] }
 0x243   : > { %5453 = vmatpush3.bf16.msra.mxu1 %v5725_v33 }
 0x244   : > { %5454 = vmatprep.subr.bf16.mxu1 %v5515_v8 }
 0x247   : > { %5456 = vmatpush3.bf16.msra.mxu1 %v5737_v41 }
 0x24a   : > { %v2405_v10 = vpop.f32.mrb[48].mxu0  ;;  %4999 = vmatmul.mubr.msk.f32.vlgmr.msra.gmra.mrb[42].mxu1 %vm805_vm3, %v787_v58 }
 0x24b   : > { %v4715_v23 = vpop.f32.mrb[49].mxu0 }
 0x24c   : > { %v3542_v23 = vld [vmem:[%s6628_s5 + $0xc8] sm:$0xff] }
 0x24d   : > { %v1611_v22 = vpop.f32.mrb[16].mxu1 }
 0x24e   : > { %v1682_v14 = vadd.f32 %v6413_v37, %v1611_v22  ;;  %v4506_v6 = vpop.f32.mrb[17].mxu1  ;;  %v5471_v22 = vpack.c.bf16 %v3524_v63, %v3523_v11  ;;  %v1540_v11 = vadd.f32 %v3798_v29, %v6478_v20  ;;  %v3826_v20 = vld [vmem:[%s6629_s6] ss:$0 sm:$0xff] }
 0x24f   : > { %v3525_v6 = vld [vmem:[%s6628_s5 + $0x40] sm:$0xff] }
 0x25a   : > { %v2553_v33 = vpop.f32.mrb[50].mxu0 }
 0x25b   : > { %v4753_v44 = vpop.f32.mrb[51].mxu0 }
 0x25c   : > { %v3543_v44 = vld [vmem:[%s6628_s5 + $0xd0] sm:$0xff] }
 0x25d   : > { %v1754_v27 = vpop.f32.mrb[18].mxu1 }
 0x25e   : > { %v1758_v38 = vadd.f32 %v1754_v27, %v1682_v14  ;;  %v4544_v36 = vpop.f32.mrb[19].mxu1  ;;  %v3544_v27 = vld [vmem:[%s6628_s5 + $0xd8] sm:$0xff] }
 0x25f   : > { %v5477_v36 = vpack.c.bf16 %v3544_v27, %v3543_v44 }
 0x260   : > { %v1829_v21 = vadd.f32 %v6429_v57, %v1758_v38  ;;  %v3518_v57 = vld [vmem:[%s6628_s5 + $0x8] sm:$0xff] }
 0x261   : > { %v5459_v52 = vpack.c.bf16 %v3518_v57, %v3517_v34 }
 0x263   : > { %5460 = vmatpush3.bf16.msra.mxu0 %v5459_v52 }
 0x264   : > { %5462 = vmatprep.subr.bf16.mxu0 %v5461_v19 }
 0x26a   : > { %v6491_v48 = vpop.f32.mrb[52].mxu0 }
 0x26b   : > { %v4791_v8 = vpop.f32.mrb[53].mxu0 }
 0x26c   : > { %v3528_v8 = vld [vmem:[%s6628_s5 + $0x58] sm:$0xff] }
 0x26d   : > { %v1899_v41 = vpop.f32.mrb[20].mxu1 }
 0x26e   : > { %v1903_v54 = vadd.f32 %v1899_v41, %v1829_v21  ;;  %v4582_v59 = vpop.f32.mrb[21].mxu1  ;;  %v3527_v21 = vld [vmem:[%s6628_s5 + $0x50] sm:$0xff]  ;;  %v3545_v41 = vld [vmem:[%s6628_s5 + $0xe0] sm:$0xff] }
 0x270   : > { %v1977_v2 = vadd.f32 %v6444_v62, %v1903_v54  ;;  %v3519_v62 = vld [vmem:[%s6628_s5 + $0x10] sm:$0xff]  ;;  %v3546_v54 = vld [vmem:[%s6628_s5 + $0xe8] sm:$0xff] }
 0x271   : > { %v5463_v32 = vpack.c.bf16 %v3520_v9, %v3519_v62 }
 0x273   : > { %5464 = vmatpush3.bf16.msra.mxu0 %v5463_v32 }
 0x27a   : > { %v6494_v39 = vpop.f32.mrb[54].mxu0 }
 0x27b   : > { %v4829_v40 = vpop.f32.mrb[55].mxu0 }
 0x27d   : > { %v2044_v53 = vpop.f32.mrb[22].mxu1 }
 0x27e   : > { %v2048_v46 = vadd.f32 %v2044_v53, %v1977_v2  ;;  %v4620_v47 = vpop.f32.mrb[23].mxu1  ;;  %v5479_v2 = vpack.c.bf16 %v3528_v8, %v3527_v21  ;;  %v5481_v53 = vpack.c.bf16 %v3546_v54, %v3545_v41 }
 0x27f   : > { %v3530_v47 = vld [vmem:[%s6628_s5 + $0x68] sm:$0xff] }
 0x280   : > { %v2122_v55 = vadd.f32 %v2118_v5, %v2048_v46  ;;  %v5465_v5 = vpack.c.bf16 %v3538_v24, %v3537_v18  ;;  %v3529_v46 = vld [vmem:[%s6628_s5 + $0x60] sm:$0xff] }
 0x282   : > { %5466 = vmatprep.subr.bf16.mxu0 %v5465_v5 }
 0x283   : > { %5468 = vmatpush3.bf16.msra.mxu0 %v5467_v50 }
 0x284   : > { %5470 = vmatprep.subr.bf16.mxu0 %v5469_v45 }
 0x287   : > { %5472 = vmatpush3.bf16.msra.mxu0 %v5471_v22 }
 0x28a   : > { %v6496_v3 = vpop.f32.mrb[56].mxu0 }
 0x28b   : > { %v4867_v4 = vpop.f32.mrb[57].mxu0 }
 0x28d   : > { %v2192_v25 = vpop.f32.mrb[24].mxu1 }
 0x28e   : > { %v6498_v56 = vadd.f32 %v2192_v25, %v2122_v55  ;;  %v4658_v61 = vpop.f32.mrb[25].mxu1 }
 0x28f   : > { %v5483_v61 = vpack.c.bf16 %v3530_v47, %v3529_v46 }
 0x290   : > { %v2197_v42 = vadd.f32 %v3798_v29, %v6498_v56 }
 0x29a   : > { %v6500_v13 = vpop.f32.mrb[58].mxu0 }
 0x29b   : > { %v4905_v28 = vpop.f32.mrb[59].mxu0 }
 0x29d   : > { %v2335_v31 = vpop.f32.mrb[26].mxu1 }
 0x29e   : > { %v2336_v16 = vadd.f32 %v2335_v31, %v2265_v49  ;;  %v4696_v37 = vpop.f32.mrb[27].mxu1 }
 0x2a0   : > { %v2409_v7 = vadd.f32 %v2405_v10, %v2336_v16  ;;  %v3541_v10 = vld [vmem:[%s6628_s5 + $0xc0] sm:$0xff] }
 0x2a1   : > { %v5473_v14 = vpack.c.bf16 %v3542_v23, %v3541_v10  ;;  %v1541_v10 = vmax.f32 %v1540_v11, 0.0 }
 0x2a3   : > { %5474 = vmatprep.subr.bf16.mxu0 %v5473_v14 }
 0x2aa   : > { %v6532_v43 = vpop.f32.mrb[60].mxu0 }
 0x2ab   : > { %v4943_v15 = vpop.f32.mrb[61].mxu0 }
 0x2ad   : > { %v2479_v49 = vpop.f32.mrb[28].mxu1 }
 0x2ae   : > { %v2483_v60 = vadd.f32 %v2479_v49, %v2409_v7  ;;  %v4734_v30 = vpop.f32.mrb[29].mxu1 }
 0x2af   : > { %v2198_v30 = vmax.f32 %v2197_v42, 0.0 }
 0x2b0   : > { %v2557_v58 = vadd.f32 %v2553_v33, %v2483_v60  ;;  %v3526_v33 = vld [vmem:[%s6628_s5 + $0x48] sm:$0xff] }
 0x2b1   : > { %v5475_v38 = vpack.c.bf16 %v3526_v33, %v3525_v6 }
 0x2b3   : > { %5476 = vmatpush3.bf16.msra.mxu0 %v5475_v38 }
 0x2b4   : > { %5478 = vmatprep.subr.bf16.mxu0 %v5477_v36 }
 0x2b7   : > { %5480 = vmatpush3.bf16.msra.mxu0 %v5479_v2 }
 0x2b8   : > { %5482 = vmatprep.subr.bf16.mxu0 %v5481_v53 }
 0x2ba   : > { %v3426_v59 = vpop.f32.mrb[62].mxu0 }
 0x2bb   : > { %v4981_v40 = vpop.f32.mrb[63].mxu0  ;;  %5484 = vmatpush3.bf16.msra.mxu0 %v5483_v61 }
 0x2bd   : > { %v2627_v55 = vpop.f32.mrb[30].mxu1 }
 0x2be   : > { %v2631_v4 = vadd.f32 %v2627_v55, %v2557_v58  ;;  %v4772_v25 = vpop.f32.mrb[31].mxu1 }
 0x2c0   : > { %v2705_v28 = vadd.f32 %v6491_v48, %v2631_v4 }
 0x2cd   : > { %v2775_v31 = vpop.f32.mrb[32].mxu1 }
 0x2ce   : > { %v2779_v16 = vadd.f32 %v2775_v31, %v2705_v28  ;;  %v4810_v37 = vpop.f32.mrb[33].mxu1 }
 0x2d0   : > { %v2853_v7 = vadd.f32 %v6494_v39, %v2779_v16  ;;  %v3547_v39 = vld [vmem:[%s6628_s5 + $0xf0] sm:$0xff] }
 0x2d2   : > { %v2854_v63 = vadd.f32 %v3798_v29, %v2853_v7 }
 0x2d4   : > { %v2855_v23 = vmax.f32 %v2854_v63, 0.0 }
 0x2dd   : > { %v2922_v1 = vpop.f32.mrb[34].mxu1 }
 0x2de   : > { %v2993_v0 = vadd.f32 %v6496_v3, %v2922_v1  ;;  %v4848_v34 = vpop.f32.mrb[35].mxu1  ;;  %v3548_v3 = vld [vmem:[%s6628_s5 + $0xf8] sm:$0xff] }
 0x2df   : > { %v5485_v15 = vpack.c.bf16 %v3548_v3, %v3547_v39 }
 0x2e1   : > { %5486 = vmatprep.subr.bf16.mxu0 %v5485_v15 }
 0x2ed   : > { %v3062_v12 = vpop.f32.mrb[36].mxu1 }
 0x2ee   : > { %v3066_v57 = vadd.f32 %v3062_v12, %v2993_v0  ;;  %v4886_v17 = vpop.f32.mrb[37].mxu1 }
 0x2f0   : > { %v3137_v26 = vadd.f32 %v6500_v13, %v3066_v57  ;;  %v3531_v13 = vld [vmem:[%s6628_s5 + $0x70] sm:$0xff] }
 0x2fd   : > { %v3207_v52 = vpop.f32.mrb[38].mxu1 }
 0x2fe   : > { %v3211_v19 = vadd.f32 %v3207_v52, %v3137_v26  ;;  %v4924_v62 = vpop.f32.mrb[39].mxu1 }
 0x300   : > { %v3285_v48 = vadd.f32 %v6532_v43, %v3211_v19  ;;  %v3532_v43 = vld [vmem:[%s6628_s5 + $0x78] sm:$0xff] }
 0x301   : > { %v5487_v5 = vpack.c.bf16 %v3532_v43, %v3531_v13 }
 0x303   : > { %5488 = vmatpush3.bf16.msra.mxu0 %v5487_v5 }
 0x30d   : > { %v3352_v9 = vpop.f32.mrb[40].mxu1 }
 0x30e   : > { %v3356_v18 = vadd.f32 %v3352_v9, %v3285_v48  ;;  %v4962_v24 = vpop.f32.mrb[41].mxu1 }
 0x310   : > { %v3430_v32 = vadd.f32 %v3426_v59, %v3356_v18 }
 0x31d   : > { %v3500_v35 = vpop.f32.mrb[42].mxu1 }
 0x31e   : > { %v3504_v51 = vadd.f32 %v3500_v35, %v3430_v32  ;;  %v5000_v49 = vpop.f32.mrb[43].mxu1 }
 0x320   : > { %v3505_v60 = vadd.f32 %v3798_v29, %v3504_v51 }
 0x322   : > { %v3506_v50 = vmax.f32 %v3505_v60, 0.0 }
 0x324   : > { %v5501_v45 = vpack.i.bf16 %v2198_v30, %v3506_v50 }
 0x326   : > { %5502 = vrot.lane.b32.xlu0 %v5501_v45, %s5518_s17 }
 0x398   : > { %v5503_v58 = vpop.permute.xlu0 %5502 }
 0x399   : > { %v5505_v22 = vunpack.i.h.bf16 %v5503_v58  ;;  %v5504_v14 = vunpack.i.l.bf16 %v5503_v58 }
 0x39b   : > { %v3516_v56 = vsel %vm805_vm3, %v2855_v23, %v5504_v14  ;;  %v3515_v6 = vsel %vm805_vm3, %v1541_v10, %v5505_v22 }
 0x39c   : > { %3620 = vmatprep.mubr.f32.mxu0 %v3516_v56 }
 0x39d   : > { %3621 = vmatmul.mubr.f32.vlgmr.msra.gmra.mrb[64].mxu0 %v3515_v6 }
 0x470   : > { %v4234_v33 = vpop.f32.mrb[64].mxu0 }
 0x471   : > { %v4235_v44 = vpop.f32.mrb[65].mxu0 }
 0x472   : > { %v4236_v27 = vadd.f32 %v4235_v44, %v4234_v33 }
 0x474   : > { %v3623_v38 = vadd.f32 %v4236_v27, %v3826_v20 }
 0x476   : > { %3626 = vst [vmem:[%s278_s23] sm:$0xff] %v3623_v38 }
 0x477 PF: > { %s17_s24 = sadd.s32 1, %s5513_s24  }
 0x478   : > { %p14_p5 = scmp.ge.s32.totalorder %s17_s24, 4  }
 0x47a   :  { %16 = sbr.rel (!%p14_p5) target bundleno = 1 (0x1), region = 86 }

</bundles_post_ra>
